<compile_context>
chip_gen: v7x
topology: tpu7x:2x2x1
jax: 0.10.0
libtpu: 0.0.40
codegen_flags: <defaults>
</compile_context>

<pallas_src>
import functools
import math

import jax
import jax.numpy as jnp
from jax.experimental import pallas as pl
from jax.experimental.pallas import tpu as pltpu


# ---------------------------------------------------------------------------
# helpers
# ---------------------------------------------------------------------------

def _const_spec(shape):
    """BlockSpec for a fully-resident operand whose block index never changes.

    Requests single-buffering (double-buffering a constant block is pure VMEM
    waste).  Falls back to a plain BlockSpec if pipeline_mode/Buffered is not
    available in this JAX version.
    """
    ndim = len(shape)
    index_map = lambda *args: (0,) * ndim
    try:
        return pl.BlockSpec(shape, index_map,
                            pipeline_mode=pl.Buffered(buffer_count=1))
    except (AttributeError, TypeError):
        return pl.BlockSpec(shape, index_map)


def _vmem_limit_bytes():
    """Generation-aware VMEM limit (~0.8x physical), with a safe fallback."""
    default = 48 * 1024 * 1024
    try:
        info = pltpu.get_tpu_info()
        cap = getattr(info, "vmem_capacity_bytes", None)
        if cap:
            return int(max(32 << 20, min(int(cap * 0.8), 112 << 20)))
    except Exception:
        pass
    return default


def _pick_batch_block(batch, seq, d_model, vmem_bytes):
    """Divisor tb of `batch`: rows=tb*seq sublane-aligned, VMEM-bounded, and
    keeping >= 2 grid steps whenever possible (v7x has 2 TensorCores)."""
    row_bytes = d_model * 4 * 6                       # rough f32 working set/row
    max_rows = max(seq, min(1024, (vmem_bytes // 3) // max(row_bytes, 1)))
    best = 1
    for t in range(1, batch + 1):
        if batch % t:
            continue
        rows = t * seq
        if rows % 8 and t != batch:                   # keep blocks sublane-aligned
            continue
        if rows > max_rows:
            continue
        if batch >= 2 and batch // t < 2:             # keep >=2 grid steps
            continue
        best = t
    return best


def _pick_ff_chunk(d_ff, rows, budget_bytes=4 << 20):
    """Chunk d_ff so the (rows, chunk) f32 FFN hidden stays within budget."""
    if rows * d_ff * 4 <= budget_bytes:
        return d_ff
    for c in (2048, 1024, 512, 256, 128):
        if c < d_ff and d_ff % c == 0 and rows * c * 4 <= budget_bytes:
            return c
    return d_ff


# ---------------------------------------------------------------------------
# fused kernel: QKV proj + per-head attention + out-proj + LN1 + FFN + LN2
# ---------------------------------------------------------------------------

def _attn_layer_kernel(tar_ref, src_ref, wq_ref, wkv_ref, wo_ref, w1_ref, w2_ref,
                       par_ref, bkv_ref, b1_ref, out_ref, ctx_ref,
                       *, nhead, d_head, tb, seq, d_model, d_ff, ff_chunk, eps):
    rows = tb * seq
    bf16 = jnp.bfloat16

    tar = tar_ref[...]                            # (rows, D) bf16 (query source)
    src = src_ref[...]                            # (rows, D) f32  (k/v + residual)
    src_bf = src.astype(bf16)

    par = par_ref[...]                            # (7, D) f32 packed params
    bq, bo, b2 = par[0:1, :], par[1:2, :], par[2:3, :]
    g1, be1 = par[3:4, :], par[4:5, :]
    g2, be2 = par[5:6, :], par[6:7, :]

    # ---- Q and fused K/V projections (K = D contraction, lane-dense N) ------
    # Wq / bq already carry the 1/sqrt(d_head) scaling (folded in the wrapper).
    q2d = jnp.dot(tar, wq_ref[...], preferred_element_type=jnp.float32) + bq
    kv2d = (jnp.dot(src_bf, wkv_ref[...], preferred_element_type=jnp.float32)
            + bkv_ref[...])                       # (rows, 2D)
    q2d = q2d.astype(bf16)
    kv2d = kv2d.astype(bf16)

    # ---- per-head attention (static unroll; batched over the tb batch dim) --
    for h in range(nhead):
        lo = h * d_head
        q_h = q2d[:, lo:lo + d_head].reshape(tb, seq, d_head)
        k_h = kv2d[:, lo:lo + d_head].reshape(tb, seq, d_head)
        v_h = kv2d[:, d_model + lo:d_model + lo + d_head].reshape(tb, seq, d_head)

        s = jnp.einsum("bqd,bkd->bqk", q_h, k_h,
                       preferred_element_type=jnp.float32)      # (tb, S, S)
        s = s - jnp.max(s, axis=-1, keepdims=True)
        p = jnp.exp(s)
        inv = 1.0 / jnp.sum(p, axis=-1, keepdims=True)           # exact softmax
        ctx_h = jnp.einsum("bqk,bkd->bqd", p.astype(bf16), v_h,
                           preferred_element_type=jnp.float32)   # (tb, S, dh)
        ctx_h = ctx_h * inv                   # fold 1/denom into (tb,S,dh) tile

        # Write this head's ctx into its lane slice of the (rows, D) scratch so
        # the output projection can be a single D-wide MXU contraction.
        ctx_ref[:, lo:lo + d_head] = ctx_h.reshape(rows, d_head).astype(bf16)

    # ---- output projection: one (rows, D) @ (D, D) matmul -------------------
    attn = jnp.dot(ctx_ref[...], wo_ref[...],
                   preferred_element_type=jnp.float32) + bo

    # ---- residual 1 (on src, per reference) + LayerNorm 1 -------------------
    x = src + attn                                # dropout1 = identity
    mu = jnp.mean(x, axis=-1, keepdims=True)
    var = jnp.mean(jnp.square(x - mu), axis=-1, keepdims=True)
    x = (x - mu) * jax.lax.rsqrt(var + eps) * g1 + be1

    # ---- FFN: Linear(D,4D) -> ReLU -> Linear(4D,D), chunked over d_ff -------
    x_bf = x.astype(bf16)
    ff = jnp.zeros((rows, d_model), jnp.float32) + b2
    for j in range(d_ff // ff_chunk):
        c0 = j * ff_chunk
        h1 = jnp.dot(x_bf, w1_ref[:, c0:c0 + ff_chunk],
                     preferred_element_type=jnp.float32)
        h1 = jnp.maximum(h1 + b1_ref[:, c0:c0 + ff_chunk], 0.0)
        ff = ff + jnp.dot(h1.astype(bf16), w2_ref[c0:c0 + ff_chunk, :],
                          preferred_element_type=jnp.float32)

    # ---- residual 2 + LayerNorm 2 --------------------------------------------
    y = x + ff                                    # dropout2 = identity
    mu2 = jnp.mean(y, axis=-1, keepdims=True)
    var2 = jnp.mean(jnp.square(y - mu2), axis=-1, keepdims=True)
    y = (y - mu2) * jax.lax.rsqrt(var2 + eps) * g2 + be2

    out_ref[...] = y.astype(out_ref.dtype)


# ---------------------------------------------------------------------------
# wrapper
# ---------------------------------------------------------------------------

def attention_layer(src, tar, params, *, nhead):
    """src, tar: (B, S, D) float32.  Returns (B, S, D) float32."""
    B, S, D = src.shape
    assert tar.shape == (B, S, D)
    assert D % nhead == 0
    dh = D // nhead
    d_ff = 4 * D
    eps = 1e-5
    scale = 1.0 / math.sqrt(dh)
    bf16 = jnp.bfloat16

    # --- parameter prep (layout plumbing + constant folding, plain XLA) ------
    wq = (params["wq"] * scale).astype(bf16)                     # scale folded in
    wkv = jnp.concatenate([params["wk"], params["wv"]], axis=1).astype(bf16)
    wo = params["wo"].astype(bf16)
    w1 = params["w1"].astype(bf16)
    w2 = params["w2"].astype(bf16)
    b_kv = jnp.concatenate([params["bk"], params["bv"]], axis=1)  # (1, 2D) f32
    par = jnp.concatenate(                                        # (7, D) f32
        [params["bq"] * scale, params["bo"], params["b2"],
         params["g1"], params["be1"], params["g2"], params["be2"]], axis=0)
    b1 = params["b1"]                                             # (1, 4D) f32

    rows_total = B * S
    tar2d = tar.reshape(rows_total, D).astype(bf16)   # matmul-only: halve bytes
    src2d = src.reshape(rows_total, D)                # f32: feeds the residual

    vmem_limit = _vmem_limit_bytes()
    tb = _pick_batch_block(B, S, D, vmem_limit)
    rows = tb * S
    ff_chunk = _pick_ff_chunk(d_ff, rows)

    kernel = functools.partial(
        _attn_layer_kernel, nhead=nhead, d_head=dh, tb=tb, seq=S,
        d_model=D, d_ff=d_ff, ff_chunk=ff_chunk, eps=eps)

    row_spec = pl.BlockSpec((rows, D), lambda b: (b, 0))

    out2d = pl.pallas_call(
        kernel,
        out_shape=jax.ShapeDtypeStruct((rows_total, D), src.dtype),
        grid_spec=pltpu.PrefetchScalarGridSpec(
            num_scalar_prefetch=0,
            grid=(B // tb,),
            in_specs=[row_spec, row_spec,
                      _const_spec((D, D)),        # wq
                      _const_spec((D, 2 * D)),    # wkv
                      _const_spec((D, D)),        # wo
                      _const_spec((D, d_ff)),     # w1
                      _const_spec((d_ff, D)),     # w2
                      _const_spec((7, D)),        # packed (1,D) params
                      _const_spec((1, 2 * D)),    # bkv
                      _const_spec((1, d_ff))],    # b1
            out_specs=row_spec,
            scratch_shapes=[pltpu.VMEM((rows, D), jnp.bfloat16)],  # ctx slab
        ),
        compiler_params=pltpu.CompilerParams(
            dimension_semantics=("parallel",),
            vmem_limit_bytes=vmem_limit),
    )(tar2d, src2d, wq, wkv, wo, w1, w2, par, b_kv, b1)

    return out2d.reshape(B, S, D)


# ---------------------------------------------------------------------------
# deterministic parameter init (shapes match the PyTorch module, weights
# stored pre-transposed so kernels compute x @ W)
# ---------------------------------------------------------------------------

def init_params(key, d_model):
    d_ff = 4 * d_model
    ks = jax.random.split(key, 8)
    scale = 0.05
    return {
        "wq": scale * jax.random.normal(ks[0], (d_model, d_model), jnp.float32),
        "wk": scale * jax.random.normal(ks[1], (d_model, d_model), jnp.float32),
        "wv": scale * jax.random.normal(ks[2], (d_model, d_model), jnp.float32),
        "bq": scale * jax.random.normal(ks[3], (1, d_model), jnp.float32),
        "bk": scale * jax.random.normal(ks[4], (1, d_model), jnp.float32),
        "bv": scale * jax.random.normal(ks[5], (1, d_model), jnp.float32),
        "wo": scale * jax.random.normal(ks[6], (d_model, d_model), jnp.float32),
        "bo": jnp.zeros((1, d_model), jnp.float32),
        "w1": scale * jax.random.normal(ks[7], (d_model, d_ff), jnp.float32),
        "b1": jnp.zeros((1, d_ff), jnp.float32),
        "w2": scale * jax.random.normal(jax.random.fold_in(key, 99),
                                        (d_ff, d_model), jnp.float32),
        "b2": jnp.zeros((1, d_model), jnp.float32),
        "g1": jnp.ones((1, d_model), jnp.float32),
        "be1": jnp.zeros((1, d_model), jnp.float32),
        "g2": jnp.ones((1, d_model), jnp.float32),
        "be2": jnp.zeros((1, d_model), jnp.float32),
    }


if __name__ == "__main__":
    # Small but lane-dense demo config: D multiple of 128 so all activation
    # blocks / stores use full vector lanes; B=2 gives a 2-step parallel grid.
    B, S, D, NHEAD = 2, 8, 128, 4

    key = jax.random.PRNGKey(0)
    k_src, k_tar, k_par = jax.random.split(key, 3)
    src = jax.random.normal(k_src, (B, S, D), jnp.float32)
    tar = jax.random.normal(k_tar, (B, S, D), jnp.float32)
    params = init_params(k_par, D)

    out = attention_layer(src, tar, params, nhead=NHEAD)
    jax.block_until_ready(out)
    assert out.shape == (B, S, D)
    assert bool(jnp.all(jnp.isfinite(out)))
    print("KERNEL_OK")
</pallas_src>

<mosaic_0001>
module attributes {stable_mosaic.version = 11 : i64} {
  func.func @_attn_layer_kernel(%arg0: i32, %arg1: memref<8x128xbf16, #tpu.memory_space<vmem>>, %arg2: memref<8x128xf32, #tpu.memory_space<vmem>>, %arg3: memref<128x128xbf16, #tpu.memory_space<vmem>>, %arg4: memref<128x256xbf16, #tpu.memory_space<vmem>>, %arg5: memref<128x128xbf16, #tpu.memory_space<vmem>>, %arg6: memref<128x512xbf16, #tpu.memory_space<vmem>>, %arg7: memref<512x128xbf16, #tpu.memory_space<vmem>>, %arg8: memref<7x128xf32, #tpu.memory_space<vmem>>, %arg9: memref<1x256xf32, #tpu.memory_space<vmem>>, %arg10: memref<1x512xf32, #tpu.memory_space<vmem>>, %arg11: memref<8x128xf32, #tpu.memory_space<vmem>>, %arg12: memref<8x128xbf16, #tpu.memory_space<vmem>>) attributes {dimension_semantics = [#tpu.dimension_semantics<parallel>], iteration_bounds = array<i64: 2>, scalar_prefetch = 0 : i64, scratch_operands = 1 : i64, tpu.core_type = #tpu.core_type<tc>, window_params = [{transform_indices = @transform_0, window_bounds = array<i64: 8, 128>}, {transform_indices = @transform_1, window_bounds = array<i64: 8, 128>}, {pipeline_mode = #tpu.pipeline_mode<synchronous>, transform_indices = @transform_2, window_bounds = array<i64: 128, 128>}, {pipeline_mode = #tpu.pipeline_mode<synchronous>, transform_indices = @transform_3, window_bounds = array<i64: 128, 256>}, {pipeline_mode = #tpu.pipeline_mode<synchronous>, transform_indices = @transform_4, window_bounds = array<i64: 128, 128>}, {pipeline_mode = #tpu.pipeline_mode<synchronous>, transform_indices = @transform_5, window_bounds = array<i64: 128, 512>}, {pipeline_mode = #tpu.pipeline_mode<synchronous>, transform_indices = @transform_6, window_bounds = array<i64: 512, 128>}, {pipeline_mode = #tpu.pipeline_mode<synchronous>, transform_indices = @transform_7, window_bounds = array<i64: 7, 128>}, {pipeline_mode = #tpu.pipeline_mode<synchronous>, transform_indices = @transform_8, window_bounds = array<i64: 1, 256>}, {pipeline_mode = #tpu.pipeline_mode<synchronous>, transform_indices = @transform_9, window_bounds = array<i64: 1, 512>}, {transform_indices = @transform_10, window_bounds = array<i64: 8, 128>}]} {
    %c0 = arith.constant 0 : index
    %c0_0 = arith.constant 0 : index
    %0 = vector.load %arg1[%c0, %c0_0] : memref<8x128xbf16, #tpu.memory_space<vmem>>, vector<8x128xbf16>
    %c0_1 = arith.constant 0 : index
    %c0_2 = arith.constant 0 : index
    %1 = vector.load %arg2[%c0_1, %c0_2] : memref<8x128xf32, #tpu.memory_space<vmem>>, vector<8x128xf32>
    %2 = arith.truncf %1 : vector<8x128xf32> to vector<8x128xbf16>
    %c0_3 = arith.constant 0 : index
    %c0_4 = arith.constant 0 : index
    %3 = vector.load %arg8[%c0_3, %c0_4] : memref<7x128xf32, #tpu.memory_space<vmem>>, vector<7x128xf32>
    %4 = vector.extract_strided_slice %3 {offsets = [0, 0], sizes = [1, 128], strides = [1, 1]} : vector<7x128xf32> to vector<1x128xf32>
    %5 = vector.extract_strided_slice %3 {offsets = [1, 0], sizes = [1, 128], strides = [1, 1]} : vector<7x128xf32> to vector<1x128xf32>
    %6 = vector.extract_strided_slice %3 {offsets = [2, 0], sizes = [1, 128], strides = [1, 1]} : vector<7x128xf32> to vector<1x128xf32>
    %7 = vector.extract_strided_slice %3 {offsets = [3, 0], sizes = [1, 128], strides = [1, 1]} : vector<7x128xf32> to vector<1x128xf32>
    %8 = vector.extract_strided_slice %3 {offsets = [4, 0], sizes = [1, 128], strides = [1, 1]} : vector<7x128xf32> to vector<1x128xf32>
    %9 = vector.extract_strided_slice %3 {offsets = [5, 0], sizes = [1, 128], strides = [1, 1]} : vector<7x128xf32> to vector<1x128xf32>
    %10 = vector.extract_strided_slice %3 {offsets = [6, 0], sizes = [1, 128], strides = [1, 1]} : vector<7x128xf32> to vector<1x128xf32>
    %c0_5 = arith.constant 0 : index
    %c0_6 = arith.constant 0 : index
    %11 = vector.load %arg3[%c0_5, %c0_6] : memref<128x128xbf16, #tpu.memory_space<vmem>>, vector<128x128xbf16>
    %cst = arith.constant dense<0.000000e+00> : vector<8x128xf32>
    %12 = tpu.matmul %0, %11, %cst {dimension_numbers = #tpu.dot_dimension_numbers<[1], [0], [0], [1], [0, 0, 1, 1], [], []>} : vector<8x128xbf16>, vector<128x128xbf16>, vector<8x128xf32> -> vector<8x128xf32>
    %13 = vector.broadcast %4 : vector<1x128xf32> to vector<8x128xf32>
    %14 = arith.addf %12, %13 : vector<8x128xf32>
    %c0_7 = arith.constant 0 : index
    %c0_8 = arith.constant 0 : index
    %15 = vector.load %arg4[%c0_7, %c0_8] : memref<128x256xbf16, #tpu.memory_space<vmem>>, vector<128x256xbf16>
    %cst_9 = arith.constant dense<0.000000e+00> : vector<8x256xf32>
    %16 = tpu.matmul %2, %15, %cst_9 {dimension_numbers = #tpu.dot_dimension_numbers<[1], [0], [0], [1], [0, 0, 1, 1], [], []>} : vector<8x128xbf16>, vector<128x256xbf16>, vector<8x256xf32> -> vector<8x256xf32>
    %c0_10 = arith.constant 0 : index
    %c0_11 = arith.constant 0 : index
    %17 = vector.load %arg9[%c0_10, %c0_11] : memref<1x256xf32, #tpu.memory_space<vmem>>, vector<1x256xf32>
    %18 = vector.broadcast %17 : vector<1x256xf32> to vector<8x256xf32>
    %19 = arith.addf %16, %18 : vector<8x256xf32>
    %20 = arith.truncf %14 : vector<8x128xf32> to vector<8x128xbf16>
    %21 = arith.truncf %19 : vector<8x256xf32> to vector<8x256xbf16>
    %22 = vector.extract_strided_slice %20 {offsets = [0, 0], sizes = [8, 32], strides = [1, 1]} : vector<8x128xbf16> to vector<8x32xbf16>
    %23 = vector.shape_cast %22 : vector<8x32xbf16> to vector<1x8x32xbf16>
    %24 = vector.extract_strided_slice %21 {offsets = [0, 0], sizes = [8, 32], strides = [1, 1]} : vector<8x256xbf16> to vector<8x32xbf16>
    %25 = vector.shape_cast %24 : vector<8x32xbf16> to vector<1x8x32xbf16>
    %26 = vector.extract_strided_slice %21 {offsets = [0, 128], sizes = [8, 32], strides = [1, 1]} : vector<8x256xbf16> to vector<8x32xbf16>
    %27 = vector.shape_cast %26 : vector<8x32xbf16> to vector<1x8x32xbf16>
    "tpu.trace_start"() <{level = 10 : i32, message = "bqd,bkd->bqk"}> : () -> ()
    %cst_12 = arith.constant dense<0.000000e+00> : vector<1x8x8xf32>
    %28 = tpu.matmul %23, %25, %cst_12 {dimension_numbers = #tpu.dot_dimension_numbers<[2], [2], [1], [1], [0, 0, 0, 1, 1, 1], [0], [0]>} : vector<1x8x32xbf16>, vector<1x8x32xbf16>, vector<1x8x8xf32> -> vector<1x8x8xf32>
    "tpu.trace_stop"() : () -> ()
    %cst_13 = arith.constant dense<0xFF800000> : vector<1x8xf32>
    %29 = vector.multi_reduction <maximumf>, %28, %cst_13 [2] : vector<1x8x8xf32> to vector<1x8xf32>
    %30 = vector.shape_cast %29 : vector<1x8xf32> to vector<1x8x1xf32>
    %31 = vector.broadcast %30 : vector<1x8x1xf32> to vector<1x8x8xf32>
    %32 = arith.subf %28, %31 : vector<1x8x8xf32>
    %33 = math.exp %32 : vector<1x8x8xf32>
    %cst_14 = arith.constant dense<0.000000e+00> : vector<1x8xf32>
    %34 = vector.multi_reduction <add>, %33, %cst_14 [2] : vector<1x8x8xf32> to vector<1x8xf32>
    %35 = vector.shape_cast %34 : vector<1x8xf32> to vector<1x8x1xf32>
    %cst_15 = arith.constant 1.000000e+00 : f32
    %36 = vector.broadcast %cst_15 : f32 to vector<1x8x1xf32>
    %37 = arith.divf %36, %35 : vector<1x8x1xf32>
    %38 = arith.truncf %33 : vector<1x8x8xf32> to vector<1x8x8xbf16>
    "tpu.trace_start"() <{level = 10 : i32, message = "bqk,bkd->bqd"}> : () -> ()
    %cst_16 = arith.constant dense<0.000000e+00> : vector<1x8x32xf32>
    %39 = tpu.matmul %38, %27, %cst_16 {dimension_numbers = #tpu.dot_dimension_numbers<[2], [1], [1], [2], [0, 0, 0, 1, 1, 2], [0], [0]>} : vector<1x8x8xbf16>, vector<1x8x32xbf16>, vector<1x8x32xf32> -> vector<1x8x32xf32>
    "tpu.trace_stop"() : () -> ()
    %40 = vector.broadcast %37 : vector<1x8x1xf32> to vector<1x8x32xf32>
    %41 = arith.mulf %39, %40 : vector<1x8x32xf32>
    %42 = vector.shape_cast %41 : vector<1x8x32xf32> to vector<8x32xf32>
    %43 = arith.truncf %42 : vector<8x32xf32> to vector<8x32xbf16>
    %c0_17 = arith.constant 0 : index
    %c0_18 = arith.constant 0 : index
    %44 = vector.load %arg12[%c0_17, %c0_18] : memref<8x128xbf16, #tpu.memory_space<vmem>>, vector<8x32xbf16>
    tpu.vector_store %arg12[%c0_17, %c0_18], %43 {strides = array<i32>} : memref<8x128xbf16, #tpu.memory_space<vmem>>, vector<8x32xbf16>,
    %45 = vector.extract_strided_slice %20 {offsets = [0, 32], sizes = [8, 32], strides = [1, 1]} : vector<8x128xbf16> to vector<8x32xbf16>
    %46 = vector.shape_cast %45 : vector<8x32xbf16> to vector<1x8x32xbf16>
    %47 = vector.extract_strided_slice %21 {offsets = [0, 32], sizes = [8, 32], strides = [1, 1]} : vector<8x256xbf16> to vector<8x32xbf16>
    %48 = vector.shape_cast %47 : vector<8x32xbf16> to vector<1x8x32xbf16>
    %49 = vector.extract_strided_slice %21 {offsets = [0, 160], sizes = [8, 32], strides = [1, 1]} : vector<8x256xbf16> to vector<8x32xbf16>
    %50 = vector.shape_cast %49 : vector<8x32xbf16> to vector<1x8x32xbf16>
    "tpu.trace_start"() <{level = 10 : i32, message = "bqd,bkd->bqk"}> : () -> ()
    %cst_19 = arith.constant dense<0.000000e+00> : vector<1x8x8xf32>
    %51 = tpu.matmul %46, %48, %cst_19 {dimension_numbers = #tpu.dot_dimension_numbers<[2], [2], [1], [1], [0, 0, 0, 1, 1, 1], [0], [0]>} : vector<1x8x32xbf16>, vector<1x8x32xbf16>, vector<1x8x8xf32> -> vector<1x8x8xf32>
    "tpu.trace_stop"() : () -> ()
    %cst_20 = arith.constant dense<0xFF800000> : vector<1x8xf32>
    %52 = vector.multi_reduction <maximumf>, %51, %cst_20 [2] : vector<1x8x8xf32> to vector<1x8xf32>
    %53 = vector.shape_cast %52 : vector<1x8xf32> to vector<1x8x1xf32>
    %54 = vector.broadcast %53 : vector<1x8x1xf32> to vector<1x8x8xf32>
    %55 = arith.subf %51, %54 : vector<1x8x8xf32>
    %56 = math.exp %55 : vector<1x8x8xf32>
    %cst_21 = arith.constant dense<0.000000e+00> : vector<1x8xf32>
    %57 = vector.multi_reduction <add>, %56, %cst_21 [2] : vector<1x8x8xf32> to vector<1x8xf32>
    %58 = vector.shape_cast %57 : vector<1x8xf32> to vector<1x8x1xf32>
    %cst_22 = arith.constant 1.000000e+00 : f32
    %59 = vector.broadcast %cst_22 : f32 to vector<1x8x1xf32>
    %60 = arith.divf %59, %58 : vector<1x8x1xf32>
    %61 = arith.truncf %56 : vector<1x8x8xf32> to vector<1x8x8xbf16>
    "tpu.trace_start"() <{level = 10 : i32, message = "bqk,bkd->bqd"}> : () -> ()
    %cst_23 = arith.constant dense<0.000000e+00> : vector<1x8x32xf32>
    %62 = tpu.matmul %61, %50, %cst_23 {dimension_numbers = #tpu.dot_dimension_numbers<[2], [1], [1], [2], [0, 0, 0, 1, 1, 2], [0], [0]>} : vector<1x8x8xbf16>, vector<1x8x32xbf16>, vector<1x8x32xf32> -> vector<1x8x32xf32>
    "tpu.trace_stop"() : () -> ()
    %63 = vector.broadcast %60 : vector<1x8x1xf32> to vector<1x8x32xf32>
    %64 = arith.mulf %62, %63 : vector<1x8x32xf32>
    %65 = vector.shape_cast %64 : vector<1x8x32xf32> to vector<8x32xf32>
    %66 = arith.truncf %65 : vector<8x32xf32> to vector<8x32xbf16>
    %c0_24 = arith.constant 0 : index
    %c32 = arith.constant 32 : index
    %67 = vector.load %arg12[%c0_24, %c32] : memref<8x128xbf16, #tpu.memory_space<vmem>>, vector<8x32xbf16>
    tpu.vector_store %arg12[%c0_24, %c32], %66 {strides = array<i32>} : memref<8x128xbf16, #tpu.memory_space<vmem>>, vector<8x32xbf16>,
    %68 = vector.extract_strided_slice %20 {offsets = [0, 64], sizes = [8, 32], strides = [1, 1]} : vector<8x128xbf16> to vector<8x32xbf16>
    %69 = vector.shape_cast %68 : vector<8x32xbf16> to vector<1x8x32xbf16>
    %70 = vector.extract_strided_slice %21 {offsets = [0, 64], sizes = [8, 32], strides = [1, 1]} : vector<8x256xbf16> to vector<8x32xbf16>
    %71 = vector.shape_cast %70 : vector<8x32xbf16> to vector<1x8x32xbf16>
    %72 = vector.extract_strided_slice %21 {offsets = [0, 192], sizes = [8, 32], strides = [1, 1]} : vector<8x256xbf16> to vector<8x32xbf16>
    %73 = vector.shape_cast %72 : vector<8x32xbf16> to vector<1x8x32xbf16>
    "tpu.trace_start"() <{level = 10 : i32, message = "bqd,bkd->bqk"}> : () -> ()
    %cst_25 = arith.constant dense<0.000000e+00> : vector<1x8x8xf32>
    %74 = tpu.matmul %69, %71, %cst_25 {dimension_numbers = #tpu.dot_dimension_numbers<[2], [2], [1], [1], [0, 0, 0, 1, 1, 1], [0], [0]>} : vector<1x8x32xbf16>, vector<1x8x32xbf16>, vector<1x8x8xf32> -> vector<1x8x8xf32>
    "tpu.trace_stop"() : () -> ()
    %cst_26 = arith.constant dense<0xFF800000> : vector<1x8xf32>
    %75 = vector.multi_reduction <maximumf>, %74, %cst_26 [2] : vector<1x8x8xf32> to vector<1x8xf32>
    %76 = vector.shape_cast %75 : vector<1x8xf32> to vector<1x8x1xf32>
    %77 = vector.broadcast %76 : vector<1x8x1xf32> to vector<1x8x8xf32>
    %78 = arith.subf %74, %77 : vector<1x8x8xf32>
    %79 = math.exp %78 : vector<1x8x8xf32>
    %cst_27 = arith.constant dense<0.000000e+00> : vector<1x8xf32>
    %80 = vector.multi_reduction <add>, %79, %cst_27 [2] : vector<1x8x8xf32> to vector<1x8xf32>
    %81 = vector.shape_cast %80 : vector<1x8xf32> to vector<1x8x1xf32>
    %cst_28 = arith.constant 1.000000e+00 : f32
    %82 = vector.broadcast %cst_28 : f32 to vector<1x8x1xf32>
    %83 = arith.divf %82, %81 : vector<1x8x1xf32>
    %84 = arith.truncf %79 : vector<1x8x8xf32> to vector<1x8x8xbf16>
    "tpu.trace_start"() <{level = 10 : i32, message = "bqk,bkd->bqd"}> : () -> ()
    %cst_29 = arith.constant dense<0.000000e+00> : vector<1x8x32xf32>
    %85 = tpu.matmul %84, %73, %cst_29 {dimension_numbers = #tpu.dot_dimension_numbers<[2], [1], [1], [2], [0, 0, 0, 1, 1, 2], [0], [0]>} : vector<1x8x8xbf16>, vector<1x8x32xbf16>, vector<1x8x32xf32> -> vector<1x8x32xf32>
    "tpu.trace_stop"() : () -> ()
    %86 = vector.broadcast %83 : vector<1x8x1xf32> to vector<1x8x32xf32>
    %87 = arith.mulf %85, %86 : vector<1x8x32xf32>
    %88 = vector.shape_cast %87 : vector<1x8x32xf32> to vector<8x32xf32>
    %89 = arith.truncf %88 : vector<8x32xf32> to vector<8x32xbf16>
    %c0_30 = arith.constant 0 : index
    %c64 = arith.constant 64 : index
    %90 = vector.load %arg12[%c0_30, %c64] : memref<8x128xbf16, #tpu.memory_space<vmem>>, vector<8x32xbf16>
    tpu.vector_store %arg12[%c0_30, %c64], %89 {strides = array<i32>} : memref<8x128xbf16, #tpu.memory_space<vmem>>, vector<8x32xbf16>,
    %91 = vector.extract_strided_slice %20 {offsets = [0, 96], sizes = [8, 32], strides = [1, 1]} : vector<8x128xbf16> to vector<8x32xbf16>
    %92 = vector.shape_cast %91 : vector<8x32xbf16> to vector<1x8x32xbf16>
    %93 = vector.extract_strided_slice %21 {offsets = [0, 96], sizes = [8, 32], strides = [1, 1]} : vector<8x256xbf16> to vector<8x32xbf16>
    %94 = vector.shape_cast %93 : vector<8x32xbf16> to vector<1x8x32xbf16>
    %95 = vector.extract_strided_slice %21 {offsets = [0, 224], sizes = [8, 32], strides = [1, 1]} : vector<8x256xbf16> to vector<8x32xbf16>
    %96 = vector.shape_cast %95 : vector<8x32xbf16> to vector<1x8x32xbf16>
    "tpu.trace_start"() <{level = 10 : i32, message = "bqd,bkd->bqk"}> : () -> ()
    %cst_31 = arith.constant dense<0.000000e+00> : vector<1x8x8xf32>
    %97 = tpu.matmul %92, %94, %cst_31 {dimension_numbers = #tpu.dot_dimension_numbers<[2], [2], [1], [1], [0, 0, 0, 1, 1, 1], [0], [0]>} : vector<1x8x32xbf16>, vector<1x8x32xbf16>, vector<1x8x8xf32> -> vector<1x8x8xf32>
    "tpu.trace_stop"() : () -> ()
    %cst_32 = arith.constant dense<0xFF800000> : vector<1x8xf32>
    %98 = vector.multi_reduction <maximumf>, %97, %cst_32 [2] : vector<1x8x8xf32> to vector<1x8xf32>
    %99 = vector.shape_cast %98 : vector<1x8xf32> to vector<1x8x1xf32>
    %100 = vector.broadcast %99 : vector<1x8x1xf32> to vector<1x8x8xf32>
    %101 = arith.subf %97, %100 : vector<1x8x8xf32>
    %102 = math.exp %101 : vector<1x8x8xf32>
    %cst_33 = arith.constant dense<0.000000e+00> : vector<1x8xf32>
    %103 = vector.multi_reduction <add>, %102, %cst_33 [2] : vector<1x8x8xf32> to vector<1x8xf32>
    %104 = vector.shape_cast %103 : vector<1x8xf32> to vector<1x8x1xf32>
    %cst_34 = arith.constant 1.000000e+00 : f32
    %105 = vector.broadcast %cst_34 : f32 to vector<1x8x1xf32>
    %106 = arith.divf %105, %104 : vector<1x8x1xf32>
    %107 = arith.truncf %102 : vector<1x8x8xf32> to vector<1x8x8xbf16>
    "tpu.trace_start"() <{level = 10 : i32, message = "bqk,bkd->bqd"}> : () -> ()
    %cst_35 = arith.constant dense<0.000000e+00> : vector<1x8x32xf32>
    %108 = tpu.matmul %107, %96, %cst_35 {dimension_numbers = #tpu.dot_dimension_numbers<[2], [1], [1], [2], [0, 0, 0, 1, 1, 2], [0], [0]>} : vector<1x8x8xbf16>, vector<1x8x32xbf16>, vector<1x8x32xf32> -> vector<1x8x32xf32>
    "tpu.trace_stop"() : () -> ()
    %109 = vector.broadcast %106 : vector<1x8x1xf32> to vector<1x8x32xf32>
    %110 = arith.mulf %108, %109 : vector<1x8x32xf32>
    %111 = vector.shape_cast %110 : vector<1x8x32xf32> to vector<8x32xf32>
    %112 = arith.truncf %111 : vector<8x32xf32> to vector<8x32xbf16>
    %c0_36 = arith.constant 0 : index
    %c96 = arith.constant 96 : index
    %113 = vector.load %arg12[%c0_36, %c96] : memref<8x128xbf16, #tpu.memory_space<vmem>>, vector<8x32xbf16>
    tpu.vector_store %arg12[%c0_36, %c96], %112 {strides = array<i32>} : memref<8x128xbf16, #tpu.memory_space<vmem>>, vector<8x32xbf16>,
    %c0_37 = arith.constant 0 : index
    %c0_38 = arith.constant 0 : index
    %114 = vector.load %arg12[%c0_37, %c0_38] : memref<8x128xbf16, #tpu.memory_space<vmem>>, vector<8x128xbf16>
    %c0_39 = arith.constant 0 : index
    %c0_40 = arith.constant 0 : index
    %115 = vector.load %arg5[%c0_39, %c0_40] : memref<128x128xbf16, #tpu.memory_space<vmem>>, vector<128x128xbf16>
    %cst_41 = arith.constant dense<0.000000e+00> : vector<8x128xf32>
    %116 = tpu.matmul %114, %115, %cst_41 {dimension_numbers = #tpu.dot_dimension_numbers<[1], [0], [0], [1], [0, 0, 1, 1], [], []>} : vector<8x128xbf16>, vector<128x128xbf16>, vector<8x128xf32> -> vector<8x128xf32>
    %117 = vector.broadcast %5 : vector<1x128xf32> to vector<8x128xf32>
    %118 = arith.addf %116, %117 : vector<8x128xf32>
    %119 = arith.addf %1, %118 : vector<8x128xf32>
    %cst_42 = arith.constant dense<0.000000e+00> : vector<8xf32>
    %120 = vector.multi_reduction <add>, %119, %cst_42 [1] : vector<8x128xf32> to vector<8xf32>
    %121 = vector.shape_cast %120 : vector<8xf32> to vector<8x1xf32>
    %cst_43 = arith.constant 1.280000e+02 : f32
    %122 = vector.broadcast %cst_43 : f32 to vector<8x1xf32>
    %123 = arith.divf %121, %122 : vector<8x1xf32>
    %124 = vector.broadcast %123 : vector<8x1xf32> to vector<8x128xf32>
    %125 = arith.subf %119, %124 : vector<8x128xf32>
    %126 = arith.mulf %125, %125 : vector<8x128xf32>
    %cst_44 = arith.constant dense<0.000000e+00> : vector<8xf32>
    %127 = vector.multi_reduction <add>, %126, %cst_44 [1] : vector<8x128xf32> to vector<8xf32>
    %128 = vector.shape_cast %127 : vector<8xf32> to vector<8x1xf32>
    %cst_45 = arith.constant 1.280000e+02 : f32
    %129 = vector.broadcast %cst_45 : f32 to vector<8x1xf32>
    %130 = arith.divf %128, %129 : vector<8x1xf32>
    %131 = vector.broadcast %123 : vector<8x1xf32> to vector<8x128xf32>
    %132 = arith.subf %119, %131 : vector<8x128xf32>
    %cst_46 = arith.constant 9.99999974E-6 : f32
    %133 = vector.broadcast %cst_46 : f32 to vector<8x1xf32>
    %134 = arith.addf %130, %133 : vector<8x1xf32>
    %135 = math.rsqrt %134 : vector<8x1xf32>
    %136 = vector.broadcast %135 : vector<8x1xf32> to vector<8x128xf32>
    %137 = arith.mulf %132, %136 : vector<8x128xf32>
    %138 = vector.broadcast %7 : vector<1x128xf32> to vector<8x128xf32>
    %139 = arith.mulf %137, %138 : vector<8x128xf32>
    %140 = vector.broadcast %8 : vector<1x128xf32> to vector<8x128xf32>
    %141 = arith.addf %139, %140 : vector<8x128xf32>
    %142 = arith.truncf %141 : vector<8x128xf32> to vector<8x128xbf16>
    %cst_47 = arith.constant 0.000000e+00 : f32
    %143 = vector.broadcast %cst_47 : f32 to vector<8x128xf32>
    %144 = vector.broadcast %6 : vector<1x128xf32> to vector<8x128xf32>
    %145 = arith.addf %143, %144 : vector<8x128xf32>
    %c0_48 = arith.constant 0 : index
    %c0_49 = arith.constant 0 : index
    %146 = vector.load %arg6[%c0_48, %c0_49] : memref<128x512xbf16, #tpu.memory_space<vmem>>, vector<128x512xbf16>
    %cst_50 = arith.constant dense<0.000000e+00> : vector<8x512xf32>
    %147 = tpu.matmul %142, %146, %cst_50 {dimension_numbers = #tpu.dot_dimension_numbers<[1], [0], [0], [1], [0, 0, 1, 1], [], []>} : vector<8x128xbf16>, vector<128x512xbf16>, vector<8x512xf32> -> vector<8x512xf32>
    %c0_51 = arith.constant 0 : index
    %c0_52 = arith.constant 0 : index
    %148 = vector.load %arg10[%c0_51, %c0_52] : memref<1x512xf32, #tpu.memory_space<vmem>>, vector<1x512xf32>
    %149 = vector.broadcast %148 : vector<1x512xf32> to vector<8x512xf32>
    %150 = arith.addf %147, %149 : vector<8x512xf32>
    %cst_53 = arith.constant 0.000000e+00 : f32
    %151 = vector.broadcast %cst_53 : f32 to vector<8x512xf32>
    %152 = arith.maximumf %150, %151 : vector<8x512xf32>
    %153 = arith.truncf %152 : vector<8x512xf32> to vector<8x512xbf16>
    %c0_54 = arith.constant 0 : index
    %c0_55 = arith.constant 0 : index
    %154 = vector.load %arg7[%c0_54, %c0_55] : memref<512x128xbf16, #tpu.memory_space<vmem>>, vector<512x128xbf16>
    %cst_56 = arith.constant dense<0.000000e+00> : vector<8x128xf32>
    %155 = tpu.matmul %153, %154, %cst_56 {dimension_numbers = #tpu.dot_dimension_numbers<[1], [0], [0], [1], [0, 0, 1, 1], [], []>} : vector<8x512xbf16>, vector<512x128xbf16>, vector<8x128xf32> -> vector<8x128xf32>
    %156 = arith.addf %145, %155 : vector<8x128xf32>
    %157 = arith.addf %141, %156 : vector<8x128xf32>
    %cst_57 = arith.constant dense<0.000000e+00> : vector<8xf32>
    %158 = vector.multi_reduction <add>, %157, %cst_57 [1] : vector<8x128xf32> to vector<8xf32>
    %159 = vector.shape_cast %158 : vector<8xf32> to vector<8x1xf32>
    %cst_58 = arith.constant 1.280000e+02 : f32
    %160 = vector.broadcast %cst_58 : f32 to vector<8x1xf32>
    %161 = arith.divf %159, %160 : vector<8x1xf32>
    %162 = vector.broadcast %161 : vector<8x1xf32> to vector<8x128xf32>
    %163 = arith.subf %157, %162 : vector<8x128xf32>
    %164 = arith.mulf %163, %163 : vector<8x128xf32>
    %cst_59 = arith.constant dense<0.000000e+00> : vector<8xf32>
    %165 = vector.multi_reduction <add>, %164, %cst_59 [1] : vector<8x128xf32> to vector<8xf32>
    %166 = vector.shape_cast %165 : vector<8xf32> to vector<8x1xf32>
    %cst_60 = arith.constant 1.280000e+02 : f32
    %167 = vector.broadcast %cst_60 : f32 to vector<8x1xf32>
    %168 = arith.divf %166, %167 : vector<8x1xf32>
    %169 = vector.broadcast %161 : vector<8x1xf32> to vector<8x128xf32>
    %170 = arith.subf %157, %169 : vector<8x128xf32>
    %cst_61 = arith.constant 9.99999974E-6 : f32
    %171 = vector.broadcast %cst_61 : f32 to vector<8x1xf32>
    %172 = arith.addf %168, %171 : vector<8x1xf32>
    %173 = math.rsqrt %172 : vector<8x1xf32>
    %174 = vector.broadcast %173 : vector<8x1xf32> to vector<8x128xf32>
    %175 = arith.mulf %170, %174 : vector<8x128xf32>
    %176 = vector.broadcast %9 : vector<1x128xf32> to vector<8x128xf32>
    %177 = arith.mulf %175, %176 : vector<8x128xf32>
    %178 = vector.broadcast %10 : vector<1x128xf32> to vector<8x128xf32>
    %179 = arith.addf %177, %178 : vector<8x128xf32>
    %c0_62 = arith.constant 0 : index
    %c0_63 = arith.constant 0 : index
    %180 = vector.load %arg11[%c0_62, %c0_63] : memref<8x128xf32, #tpu.memory_space<vmem>>, vector<8x128xf32>
    tpu.vector_store %arg11[%c0_62, %c0_63], %179 {strides = array<i32>} : memref<8x128xf32, #tpu.memory_space<vmem>>, vector<8x128xf32>,
    return
  }
  func.func @transform_0(%arg0: i32) -> (i32, i32) {
    %c0_i32 = arith.constant 0 : i32
    %c0_i32_0 = arith.constant 0 : i32
    return %arg0, %c0_i32 : i32, i32
  }
  func.func @transform_1(%arg0: i32) -> (i32, i32) {
    %c0_i32 = arith.constant 0 : i32
    %c0_i32_0 = arith.constant 0 : i32
    return %arg0, %c0_i32 : i32, i32
  }
  func.func @transform_2(%arg0: i32) -> (i32, i32) {
    %c0_i32 = arith.constant 0 : i32
    %c0_i32_0 = arith.constant 0 : i32
    %c0_i32_1 = arith.constant 0 : i32
    return %c0_i32, %c0_i32_0 : i32, i32
  }
  func.func @transform_3(%arg0: i32) -> (i32, i32) {
    %c0_i32 = arith.constant 0 : i32
    %c0_i32_0 = arith.constant 0 : i32
    %c0_i32_1 = arith.constant 0 : i32
    return %c0_i32, %c0_i32_0 : i32, i32
  }
  func.func @transform_4(%arg0: i32) -> (i32, i32) {
    %c0_i32 = arith.constant 0 : i32
    %c0_i32_0 = arith.constant 0 : i32
    %c0_i32_1 = arith.constant 0 : i32
    return %c0_i32, %c0_i32_0 : i32, i32
  }
  func.func @transform_5(%arg0: i32) -> (i32, i32) {
    %c0_i32 = arith.constant 0 : i32
    %c0_i32_0 = arith.constant 0 : i32
    %c0_i32_1 = arith.constant 0 : i32
    return %c0_i32, %c0_i32_0 : i32, i32
  }
  func.func @transform_6(%arg0: i32) -> (i32, i32) {
    %c0_i32 = arith.constant 0 : i32
    %c0_i32_0 = arith.constant 0 : i32
    %c0_i32_1 = arith.constant 0 : i32
    return %c0_i32, %c0_i32_0 : i32, i32
  }
  func.func @transform_7(%arg0: i32) -> (i32, i32) {
    %c0_i32 = arith.constant 0 : i32
    %c0_i32_0 = arith.constant 0 : i32
    %c0_i32_1 = arith.constant 0 : i32
    return %c0_i32, %c0_i32_0 : i32, i32
  }
  func.func @transform_8(%arg0: i32) -> (i32, i32) {
    %c0_i32 = arith.constant 0 : i32
    %c0_i32_0 = arith.constant 0 : i32
    %c0_i32_1 = arith.constant 0 : i32
    return %c0_i32, %c0_i32_0 : i32, i32
  }
  func.func @transform_9(%arg0: i32) -> (i32, i32) {
    %c0_i32 = arith.constant 0 : i32
    %c0_i32_0 = arith.constant 0 : i32
    %c0_i32_1 = arith.constant 0 : i32
    return %c0_i32, %c0_i32_0 : i32, i32
  }
  func.func @transform_10(%arg0: i32) -> (i32, i32) {
    %c0_i32 = arith.constant 0 : i32
    %c0_i32_0 = arith.constant 0 : i32
    return %arg0, %c0_i32 : i32, i32
  }
}

</mosaic_0001>

<bundles_post_ra>
// kernel: tpu_custom_call.1
= control target key start
LH: loop header
LB: loop body
LE: loop exit
PB: predicated region body
PF: predicated region fallthrough
CT: control target
= control target key end

     0   :  { %s3583_s0 = inlined_call_operand.hbm [shape: bf16[16,128], index: 0, kind: input, shape index: {}]   ;;  %s3584_s1 = inlined_call_operand.hbm [shape: f32[16,128], index: 1, kind: input, shape index: {}]   ;;  %s3585_s2 = inlined_call_operand.hbm [shape: bf16[128,128], index: 2, kind: input, shape index: {}]   ;;  %s3586_s3 = inlined_call_operand.hbm [shape: bf16[128,256], index: 3, kind: input, shape index: {}]   ;;  %s3587_s4 = inlined_call_operand.hbm [shape: bf16[128,128], index: 4, kind: input, shape index: {}]   ;;  %s3588_s5 = inlined_call_operand.hbm [shape: bf16[128,512], index: 5, kind: input, shape index: {}]   ;;  %s3589_s6 = inlined_call_operand.hbm [shape: bf16[512,128], index: 6, kind: input, shape index: {}]   ;;  %s3590_s7 = inlined_call_operand.vmem [shape: f32[7,128], index: 7, kind: input, shape index: {}]   ;;  %s3591_s8 = inlined_call_operand.vmem [shape: f32[1,256], index: 8, kind: input, shape index: {}]   ;;  %s3592_s9 = inlined_call_operand.vmem [shape: f32[1,512], index: 9, kind: input, shape index: {}]   ;;  %s3593_s10 = inlined_call_operand.hbm [shape: f32[16,128], index: 10, kind: output, shape index: {}]  }
   0x1   :  { %3603 = sst [smem:[#allocation22_spill]] %s3583_s0 }
   0x2   :  { %3604 = sst [smem:[#allocation23_spill]] %s3585_s2 }
   0x3   :  { %3605 = sst [smem:[#allocation24_spill]] %s3586_s3 }
   0x4   :  { %3606 = sst [smem:[#allocation25_spill]] %s3587_s4 }
   0x5   :  { %3607 = sst [smem:[#allocation26_spill]] %s3592_s9 }
   0x6   :  { %3608 = sst [smem:[#allocation27_spill]] %s3593_s10 }
   0x7   :  { %15 = vsyncpa [#allocation4], 0 }
   0x8   :  { %17 = vsyncpa [#allocation4 + $0x1], 0 }
   0x9   :  { %18 = vsyncpa [#allocation7], 0 }
   0xa   :  { %20 = vsyncpa [#allocation7 + $0x1], 0 }
   0xb   :  { %21 = vsyncpa [#allocation10], 0 }
   0xc   :  { %22 = vsyncpa [#allocation13], 0 }
   0xd   :  { %23 = vsyncpa [#allocation5], 0 }
   0xe   :  { %25 = vsyncpa [#allocation5 + $0x1], 0  ;;  %s3093_s13 = smov 0   ;;  %s3095_s14 = smov 0  }
   0xf   :  { %s3097_s15 = smov 0   ;;  %s3099_s16 = smov 0  }
  0x10 LB: > { %s3018_s17 = smov [#allocation8]   ;;  %s3114_s19 = sadd.s32 4294967295, %s3016_s16   ;;  %s3016_s16 = sphi %s3099_s16, %s3640_s16   ;;  %s3012_s15 = sphi %s3097_s15, %s3639_s15   ;;  %s3008_s14 = sphi %s3095_s14, %s3638_s14   ;;  %s3004_s13 = sphi %s3093_s13, %s3637_s13  }
  0x11   : > { %s294_s18 = sshll.u32 %s3018_s17, 4  ;;  %p2180_p0 = scmp.ge.s32.totalorder %s3016_s16, 1  ;;  %s3119_s18 = int_to_ptr.vmem [resolvable:$true] %s294_s18 }
  0x12   : > { %p3597_p1 = scmp.eq.s32.totalorder %s3114_s19, 0  ;;  %p282_p2 = scmp.lt.s32.totalorder %s3016_s16, 3 }
  0x13   : > { %s3019_s21 = smov [#allocation9]   ;;  %s3020_s24 = smov [#allocation12]  }
  0x14   : > { %p3121_p3 = pnand %p2180_p0, %p282_p2  ;;  %s307_s22 = sshll.u32 %s3019_s21, 4  ;;  %s3134_s22 = int_to_ptr.vmem [resolvable:$true] %s307_s22 }
  0x15   : > { %s3136_s25 = sshll.u32 %s3020_s24, 4  ;;  %s3611_s2 = sld [smem:[#allocation23_spill]]  ;;  %s334_s25 = int_to_ptr.vmem [resolvable:$true] %s3136_s25 }
  0x16   : > { %s3609_s20 = scalar_select %p3121_p3, 1, 0 }
  0x17   : > { %p2506_p5 = pneg %p3121_p3 }
  0x19   : > { %p3130_p6 = pnand %p2506_p5, %p3597_p1 }
  0x1b   : > { %s2734_s28 = scalar_lea.hbm %s3611_s2, 1024  ;;  %p3146_p8 = pneg %p3130_p6 }
  0x1c   : > { %p2735_p7 = scmp.ne.s32.totalorder %s3611_s2, %s2734_s28  ;;  %p2741_p11 = scmp.lt.u32.totalorder %s2734_s28, %s3611_s2 }
  0x1e   : > { %p2737_p9 = pnand %p3146_p8, %p2735_p7 }
  0x20   : > { %p2738_p10 = pneg %p2737_p9 }
  0x22   : > { %p2743_p12 = pnand %p2741_p11, %p2738_p10 }
  0x24   : > { %2746 = shalt.err (!%p2743_p12)
}
  0x25   : > { %s2747_s21 = scalar_lea.vmem %s3119_s18, 1024  ;;  %p2755_p5 = scmp.lt.s32.totalorder %s3119_s18, %s3119_s18 }
  0x26   : > { %p2748_p13 = scmp.ne.s32.totalorder %s3119_s18, %s2747_s21  ;;  %p2756_p4 = scmp.lt.s32.totalorder %s2747_s21, %s2747_s21 }
  0x28   : > { %p2750_p0 = pnand %p2748_p13, %p3146_p8  ;;  %p2757_p7 = por %p2756_p4, %p2755_p5 }
  0x2a   : > { %p2751_p2 = pneg %p2750_p0 }
  0x2c   : > { %p2758_p9 = pnand %p2757_p7, %p2751_p2 }
  0x2e   : > { %2761 = shalt.err (!%p2758_p9)
}
  0x2f   : > { %s3595_s24 = smov 64   ;;  %s3599_s26 = smov 4  }
  0x30   : > { %2509 = dma.hbm_to_vmem [thread:$0]  (!%p3130_p6), %s3611_s2, 1024, %s3119_s18, [#allocation7], %s3595_s24, %s3595_s24, %s3599_s26  }
  0x31   : > { %s3613_s3 = sld [smem:[#allocation24_spill]] }
  0x37   : > { %s2762_s12 = scalar_lea.hbm %s3613_s3, 2048 }
  0x38   : > { %p2763_p4 = scmp.ne.s32.totalorder %s3613_s3, %s2762_s12  ;;  %p2769_p12 = scmp.lt.u32.totalorder %s2762_s12, %s3613_s3 }
  0x3a   : > { %p2765_p10 = pnand %p2763_p4, %p3146_p8 }
  0x3c   : > { %p2766_p11 = pneg %p2765_p10 }
  0x3e   : > { %p2771_p13 = pnand %p2769_p12, %p2766_p11 }
  0x40   : > { %2774 = shalt.err (!%p2771_p13)
}
  0x41   : > { %s2775_s18 = scalar_lea.vmem %s3134_s22, 2048  ;;  %p2783_p7 = scmp.lt.s32.totalorder %s3134_s22, %s3134_s22 }
  0x42   : > { %p2776_p0 = scmp.ne.s32.totalorder %s3134_s22, %s2775_s18  ;;  %p2784_p9 = scmp.lt.s32.totalorder %s2775_s18, %s2775_s18 }
  0x44   : > { %p2778_p2 = pnand %p2776_p0, %p3146_p8  ;;  %p2785_p4 = por %p2784_p9, %p2783_p7 }
  0x46   : > { %p2779_p5 = pneg %p2778_p2 }
  0x48   : > { %p2786_p10 = pnand %p2785_p4, %p2779_p5 }
  0x4a   : > { %2789 = shalt.err (!%p2786_p10)
}
  0x4b   : > { %s3023_s27 = smov 128   ;;  %s3024_s9 = smov 8  }
  0x4c   : > { %2512 = dma.hbm_to_vmem [thread:$0]  (!%p3130_p6), %s3613_s3, 2048, %s3134_s22, [#allocation10], %s3023_s27, %s3023_s27, %s3024_s9  }
  0x4d   : > { %s2790_s12 = scalar_lea.hbm %s3588_s5, 4096 }
  0x4e   : > { %p2791_p11 = scmp.ne.s32.totalorder %s3588_s5, %s2790_s12  ;;  %p2797_p0 = scmp.lt.u32.totalorder %s2790_s12, %s3588_s5 }
  0x50   : > { %p2793_p12 = pnand %p2791_p11, %p3146_p8 }
  0x52   : > { %p2794_p13 = pneg %p2793_p12 }
  0x54   : > { %p2799_p2 = pnand %p2797_p0, %p2794_p13 }
  0x56   : > { %2802 = shalt.err (!%p2799_p2)
}
  0x57   : > { %s2803_s10 = scalar_lea.vmem %s334_s25, 4096  ;;  %p2811_p4 = scmp.lt.s32.totalorder %s334_s25, %s334_s25 }
  0x58   : > { %p2804_p5 = scmp.ne.s32.totalorder %s334_s25, %s2803_s10  ;;  %p2812_p10 = scmp.lt.s32.totalorder %s2803_s10, %s2803_s10 }
  0x5a   : > { %p2806_p7 = pnand %p2804_p5, %p3146_p8  ;;  %p2813_p1 = por %p2812_p10, %p2811_p4 }
  0x5c   : > { %p2807_p9 = pneg %p2806_p7 }
  0x5e   : > { %p2814_p3 = pnand %p2813_p1, %p2807_p9 }
  0x60   : > { %2817 = shalt.err (!%p2814_p3)
}
  0x61   : > { %s3025_s22 = smov 256   ;;  %s3026_s27 = smov 16  }
  0x62   : > { %2518 = dma.hbm_to_vmem [thread:$0]  (!%p3130_p6), %s3588_s5, 4096, %s334_s25, [#allocation13], %s3025_s22, %s3025_s22, %s3026_s27  }
  0x63   : > { %s3027_s28 = smov [#allocation11]   ;;  %s3028_s30 = smov [#allocation14]  }
  0x64   : > { %s320_s29 = sshll.u32 %s3027_s28, 4  ;;  %s346_s12 = sshll.u32 %s3028_s30, 4  ;;  %s321_s29 = int_to_ptr.vmem [resolvable:$true] %s320_s29  ;;  %s347_s12 = int_to_ptr.vmem [resolvable:$true] %s346_s12 }
  0x65   : > { %s3614_s4 = sld [smem:[#allocation25_spill]] }
  0x6b   : > { %s2818_s18 = scalar_lea.hbm %s3614_s4, 1024 }
  0x6c   : > { %p2819_p1 = scmp.ne.s32.totalorder %s3614_s4, %s2818_s18  ;;  %p2825_p12 = scmp.lt.u32.totalorder %s2818_s18, %s3614_s4 }
  0x6e   : > { %p2821_p3 = pnand %p2819_p1, %p3146_p8 }
  0x70   : > { %p2822_p11 = pneg %p2821_p3 }
  0x72   : > { %p2827_p13 = pnand %p2825_p12, %p2822_p11 }
  0x74   : > { %2830 = shalt.err (!%p2827_p13)
}
  0x75   : > { %s2831_s25 = scalar_lea.vmem %s321_s29, 1024  ;;  %p2839_p7 = scmp.lt.s32.totalorder %s321_s29, %s321_s29 }
  0x76   : > { %p2832_p0 = scmp.ne.s32.totalorder %s321_s29, %s2831_s25  ;;  %p2840_p9 = scmp.lt.s32.totalorder %s2831_s25, %s2831_s25 }
  0x78   : > { %p2834_p2 = pnand %p2832_p0, %p3146_p8  ;;  %p2841_p4 = por %p2840_p9, %p2839_p7 }
  0x7a   : > { %p2835_p5 = pneg %p2834_p2 }
  0x7c   : > { %p2842_p10 = pnand %p2841_p4, %p2835_p5 }
  0x7e   : > { %2845 = shalt.err (!%p2842_p10)
}
  0x7f   : > { %s3615_s26 = smov 4   ;;  %s3616_s22 = smov 64  }
  0x80   : > { %2515 = dma.hbm_to_vmem [thread:$0]  (!%p3130_p6), %s3614_s4, 1024, %s321_s29, [#allocation10], %s3616_s22, %s3616_s22, %s3615_s26  }
  0x81   : > { %s2846_s9 = scalar_lea.hbm %s3589_s6, 4096 }
  0x82   : > { %p2847_p1 = scmp.ne.s32.totalorder %s3589_s6, %s2846_s9  ;;  %p2853_p12 = scmp.lt.u32.totalorder %s2846_s9, %s3589_s6 }
  0x84   : > { %p2849_p3 = pnand %p2847_p1, %p3146_p8 }
  0x86   : > { %p2850_p11 = pneg %p2849_p3 }
  0x88   : > { %p2855_p13 = pnand %p2853_p12, %p2850_p11 }
  0x8a   : > { %2858 = shalt.err (!%p2855_p13)
}
  0x8b   : > { %s2859_s18 = scalar_lea.vmem %s347_s12, 4096  ;;  %p2867_p7 = scmp.lt.s32.totalorder %s347_s12, %s347_s12 }
  0x8c   : > { %p2860_p0 = scmp.ne.s32.totalorder %s347_s12, %s2859_s18  ;;  %p2868_p9 = scmp.lt.s32.totalorder %s2859_s18, %s2859_s18 }
  0x8e   : > { %p2862_p2 = pnand %p2860_p0, %p3146_p8  ;;  %p2869_p4 = por %p2868_p9, %p2867_p7 }
  0x90   : > { %p2863_p5 = pneg %p2862_p2 }
  0x92   : > { %p2870_p10 = pnand %p2869_p4, %p2863_p5 }
  0x94   : > { %2873 = shalt.err (!%p2870_p10)
}
  0x95   : > { %2521 = dma.hbm_to_vmem [thread:$0]  (!%p3130_p6), %s3589_s6, 4096, %s347_s12, [#allocation13], %s3616_s22, %s3616_s22, %s3615_s26  }
  0x96   : > { %s2179_s23 = sadd.s32 4294967294, %s3016_s16   ;;  %s3256_s11 = sadd.s32 1, %s3016_s16  }
  0x97   : > { %s38_s25 = sadd.s32 1, %s3012_s15  ;;  %s35_s2 = ssub.s32 %s3016_s16, %s3256_s11 }
  0x98   : > { %p45_p8 = scmp.ne.s32.totalorder %s3012_s15, %s3008_s14  ;;  %p36_p1 = scmp.eq.s32.totalorder %s35_s2, 0 }
  0x99   : > { %p46_p3 = scmp.eq.s32.totalorder %s3016_s16, 0  ;;  %p51_p11 = scmp.ne.s32.totalorder %s3008_s14, %s3004_s13 }
  0x9a   : > { %p269_p12 = scmp.eq.s32.totalorder %s3114_s19, 1  ;;  %p3617_p0 = scmp.eq.s32.totalorder %s3114_s19, 0 }
  0x9b   : > { %s3268_s3 = scalar_select %p36_p1, %s3012_s15, %s38_s25  }
  0x9c   : > { %p47_p13 = por %p46_p3, %p45_p8  ;;  %p3272_p2 = por %p3617_p0, %p51_p11 }
  0x9d   : > { %p3276_p6 = por %p269_p12, %p45_p8  ;;  %p275_p5 = scmp.eq.s32.totalorder %s2179_s23, 1 }
  0x9e   : > { %s3618_s12 = scalar_select %p3272_p2, 1, 0 }
  0x9f   : > { %s3619_s26 = scalar_select %p3276_p6, 1, 0 }
  0xa0   : > { %p2538_p7 = scmp.lt.s32.totalorder %s3016_s16, 2  ;;  %s3282_s22 = sand.u32 1, %s3012_s15  }
  0xa1   : > { %p3284_p9 = por %p275_p5, %p51_p11  ;;  %s2187_s24 = sshll.u32 %s3282_s22, 2 }
  0xa2   : > { %s2188_s9 = sshll.u32 %s3016_s16, 6  ;;  %s3621_s0 = sld [smem:[#allocation22_spill]] }
  0xa3   : > { %s3620_s27 = scalar_select %p3284_p9, 1, 0 }
  0xa4   : > { %s373_s21 = scalar_lea.vmem [#allocation3], %s2187_s24  ;;  %p3295_p4 = pnand %p2538_p7, %p47_p13 }
  0xa5   : > { %s380_s18 = sshll.u32 %s373_s21, 4  ;;  %s370_s23 = scalar_lea.sflag [#allocation4], %s3282_s22  ;;  %s3299_s18 = int_to_ptr.vmem [resolvable:$true] %s380_s18 }
  0xa6   : > { %p2876_p8 = pneg %p3295_p4 }
  0xa8   : > { %s3293_s17 = scalar_lea.hbm %s3621_s0, %s2188_s9  ;;  %s2879_s9 = scalar_lea.hbm %s3621_s0, 128 }
  0xa9   : > { %s2874_s25 = scalar_lea.hbm %s3293_s17, 64  ;;  %p2880_p11 = scmp.lt.u32.totalorder %s3293_s17, %s3621_s0 }
  0xaa   : > { %p2875_p10 = scmp.ne.s32.totalorder %s3293_s17, %s2874_s25  ;;  %p2881_p12 = scmp.lt.u32.totalorder %s2879_s9, %s2874_s25 }
  0xab   : > { %p2883_p0 = scmp.lt.u32.totalorder %s2874_s25, %s3293_s17 }
  0xac   : > { %p2877_p1 = pnand %p2876_p8, %p2875_p10  ;;  %p2882_p13 = por %p2881_p12, %p2880_p11 }
  0xae   : > { %p2878_p3 = pneg %p2877_p1  ;;  %p2884_p5 = por %p2883_p0, %p2882_p13 }
  0xb0   : > { %p2885_p7 = pnand %p2884_p5, %p2878_p3 }
  0xb2   : > { %2888 = shalt.err (!%p2885_p7)
}
  0xb3   : > { %s2889_s21 = scalar_lea.vmem %s3299_s18, 64  ;;  %s3029_s2 = smov [#allocation3]  }
  0xb4   : > { %p2890_p10 = scmp.ne.s32.totalorder %s3299_s18, %s2889_s21  ;;  %s2894_s24 = sshll.u32 %s3029_s2, 4  ;;  %s2895_s24 = int_to_ptr.vmem [resolvable:$false] %s2894_s24 }
  0xb5   : > { %s2896_s28 = scalar_lea.vmem %s2895_s24, 128  ;;  %p2897_p6 = scmp.lt.s32.totalorder %s3299_s18, %s2895_s24 }
  0xb6   : > { %p2892_p1 = pnand %p2890_p10, %p2876_p8  ;;  %p2898_p11 = scmp.lt.s32.totalorder %s2896_s28, %s2889_s21 }
  0xb8   : > { %p2893_p9 = pneg %p2892_p1  ;;  %p2899_p12 = por %p2898_p11, %p2897_p6 }
  0xba   : > { %p2900_p13 = pnand %p2899_p12, %p2893_p9 }
  0xbc   : > { %2903 = shalt.err (!%p2900_p13)
}
  0xbd   : > { %2525 = dma.hbm_to_vmem [thread:$0]  (!%p3295_p4), %s3293_s17, 64, %s3299_s18, %s370_s23  }
  0xbe   : > { %s2189_s25 = sshll.u32 %s3282_s22, 3  ;;  %s2190_s9 = sshll.u32 %s3016_s16, 7 }
  0xbf   : > { %s3333_s10 = scalar_lea.hbm %s3584_s1, %s2190_s9  ;;  %s391_s21 = scalar_lea.vmem [#allocation6], %s2189_s25 }
  0xc0   : > { %s398_s24 = sshll.u32 %s391_s21, 4  ;;  %s3623_s28 = sand.u32 1, %s3016_s16   ;;  %s399_s24 = int_to_ptr.vmem [resolvable:$true] %s398_s24 }
  0xc1   : > { %s388_s0 = scalar_lea.sflag [#allocation7], %s3623_s28  ;;  %s2904_s4 = scalar_lea.hbm %s3333_s10, 128 }
  0xc2   : > { %p2905_p6 = scmp.ne.s32.totalorder %s3333_s10, %s2904_s4  ;;  %s2909_s18 = scalar_lea.hbm %s3584_s1, 256 }
  0xc3   : > { %p2910_p0 = scmp.lt.u32.totalorder %s3333_s10, %s3584_s1  ;;  %p2911_p5 = scmp.lt.u32.totalorder %s2909_s18, %s2904_s4 }
  0xc4   : > { %p2907_p9 = pnand %p2905_p6, %p2876_p8  ;;  %p2913_p10 = scmp.lt.u32.totalorder %s2904_s4, %s3333_s10 }
  0xc5   : > { %p2912_p7 = por %p2911_p5, %p2910_p0 }
  0xc6   : > { %p2908_p3 = pneg %p2907_p9 }
  0xc7   : > { %p2914_p1 = por %p2913_p10, %p2912_p7 }
  0xc9   : > { %p2915_p11 = pnand %p2914_p1, %p2908_p3 }
  0xcb   : > { %2918 = shalt.err (!%p2915_p11)
}
  0xcc   : > { %s2919_s25 = scalar_lea.vmem %s399_s24, 128  ;;  %s3030_s30 = smov [#allocation6]  }
  0xcd   : > { %p2920_p12 = scmp.ne.s32.totalorder %s399_s24, %s2919_s25  ;;  %s2924_s2 = sshll.u32 %s3030_s30, 4  ;;  %s2925_s2 = int_to_ptr.vmem [resolvable:$false] %s2924_s2 }
  0xce   : > { %s2926_s21 = scalar_lea.vmem %s2925_s2, 256  ;;  %p2927_p9 = scmp.lt.s32.totalorder %s399_s24, %s2925_s2 }
  0xcf   : > { %p2922_p13 = pnand %p2920_p12, %p2876_p8  ;;  %p2928_p2 = scmp.lt.s32.totalorder %s2926_s21, %s2919_s25 }
  0xd1   : > { %p2923_p6 = pneg %p2922_p13  ;;  %p2929_p0 = por %p2928_p2, %p2927_p9 }
  0xd3   : > { %p2930_p5 = pnand %p2929_p0, %p2923_p6 }
  0xd5   : > { %2933 = shalt.err (!%p2930_p5)
}
  0xd6   : > { %2528 = dma.hbm_to_vmem [thread:$0]  (!%p3295_p4), %s3333_s10, 128, %s399_s24, %s388_s0  }
  0xd7   : > { %p3624_p3 = scmp.ne.s32.totalorder %s3609_s20, 0 }
  0xd8   : > { %s3359_s4 = sand.u32 (!%p3624_p3), 1, %s3008_s14   ;;  %p3625_p2 = scmp.ne.s32.totalorder (!%p3624_p3), %s3618_s12, 0 }
  0xd9   : > { %407 = sbr.rel (%p3624_p3) target bundleno = 2898 (0xb52), region = 60  ;;  %s2192_s28 = sshll.u32 (!%p3624_p3), %s3359_s4, 2 }
  0xda   : > { %s410_s22 = scalar_lea.sflag (!%p3624_p3), [#allocation4], %s3359_s4  ;;  %s3363_s17 = scalar_lea.vmem (!%p3624_p3), [#allocation3], %s2192_s28 }
  0xe0   : > { %2979 = dma.done.wait (%p3625_p2), %s410_s22, 64  }
  0xe1   : > { %2981 = vsyncadd (%p3625_p2), %s410_s22, 4294967232  ;;  %s418_s0 = sand.u32 1, %s3114_s19   ;;  %s2193_s20 = sshll.u32 %s3359_s4, 3 }
  0xe2   : > { %s419_s29 = scalar_lea.sflag [#allocation7], %s418_s0  ;;  %s3373_s10 = scalar_lea.vmem [#allocation6], %s2193_s20 }
  0xe3   : > { %2983 = dma.done.wait (%p3625_p2), %s419_s29, 128  }
  0xe4   : > { %2985 = vsyncadd (%p3625_p2), %s419_s29, 4294967168  ;;  %p3626_p4 = scmp.eq.s32.totalorder %s3114_s19, 0 }
  0xe6   : > { %2987 = dma.done.wait (%p3626_p4), [#allocation7], 1024   ;;  %p3627_p8 = pmov %p3626_p4 }
  0xe7   : > { %p3628_p7 = pmov %p3626_p4 }
  0xe8   : > { %2989 = vsyncadd (%p3627_p8), [#allocation7], 4294966272 }
  0xe9   : > { %2991 = dma.done.wait (%p3628_p7), [#allocation10], 3072   ;;  %p3629_p10 = pmov %p3626_p4 }
  0xea   : > { %p3630_p1 = pmov %p3626_p4 }
  0xeb   : > { %2993 = vsyncadd (%p3629_p10), [#allocation10], 4294964224 }
  0xec   : > { %2995 = dma.done.wait (%p3630_p1), [#allocation13], 8192   ;;  %p3631_p11 = pmov %p3630_p1 }
  0xed   : > { %v3031_v0 = vmov 0.0   ;;  %vm3032_vm0 = vmmov 0   ;;  %v3033_v1 = vmov 0   ;;  %v2594_v2 = vld [vmem:[#allocation8] sm:$0xff]   ;;  %v2598_v5 = vld [vmem:[#allocation8 + $0x8] sm:$0xff]   ;;  %v2602_v8 = vld [vmem:[#allocation8 + $0x10] sm:$0xff]   ;;  %v505_v29 = vlaneseq }
  0xee   : > { %2997 = vsyncadd (%p3631_p11), [#allocation13], 4294959104  ;;  %2392 = vmatprep.subr.bf16.mxu0 %v3031_v0  ;;  %2408 = vmatprep.mubr.msk.bf16.mxu0 %vm3032_vm0, %v3031_v0  ;;  %v2595_v3 = vld [vmem:[#allocation9 + $0x4] ss:$8 sps:$4 sm:$0xff]   ;;  %v2597_v4 = vld [vmem:[#allocation9] ss:$8 sps:$4 sm:$0xff]  }
  0xef   : > { %737 = vmatprep.mubr.bf16.mxu1 %v3033_v1  ;;  %2393 = vmatpush3.bf16.msra.mxu0 %v2594_v2  ;;  %v2599_v6 = vld [vmem:[#allocation9 + $0x14] ss:$8 sps:$4 sm:$0xff]   ;;  %v2601_v7 = vld [vmem:[#allocation9 + $0x10] ss:$8 sps:$4 sm:$0xff]   ;;  %v2603_v9 = vld [vmem:[#allocation9 + $0x24] ss:$8 sps:$4 sm:$0xff]  }
  0xf0   : > { %705 = vmatprep.subr.bf16.mxu1 %v2595_v3  ;;  %2394 = vmatprep.subr.bf16.mxu0 %v3031_v0  ;;  %v2605_v10 = vld [vmem:[#allocation9 + $0x20] ss:$8 sps:$4 sm:$0xff]   ;;  %v2607_v11 = vld [vmem:[#allocation9 + $0x34] ss:$8 sps:$4 sm:$0xff]   ;;  %v2609_v13 = vld [vmem:[#allocation9 + $0x30] ss:$8 sps:$4 sm:$0xff]  }
  0xf1   : > { %706 = vmatpush1.bf16.msra.mxu1 %v2597_v4  ;;  %v2606_v12 = vld [vmem:[#allocation8 + $0x18] sm:$0xff]   ;;  %v2611_v14 = vld [vmem:[#allocation9 + $0x44] ss:$8 sps:$4 sm:$0xff]   ;;  %v2613_v16 = vld [vmem:[#allocation9 + $0x40] ss:$8 sps:$4 sm:$0xff]   ;;  %v3414_v30 = vshrl.u32 %v505_v29, 7 }
  0xf2   : > { %707 = vmatprep.subr.bf16.mxu1 %v2599_v6  ;;  %v2610_v15 = vld [vmem:[#allocation8 + $0x20] sm:$0xff]   ;;  %v2615_v17 = vld [vmem:[#allocation9 + $0x54] ss:$8 sps:$4 sm:$0xff]   ;;  %v2614_v18 = vld [vmem:[#allocation8 + $0x28] sm:$0xff]   ;;  %vm749_vm1 = vcmask 261120   ;;  %s3034_s9 = smov 96  }
  0xf3   : > { %2395 = vmatpush3.bf16.msra.mxu0 %v2598_v5  ;;  %v2617_v19 = vld [vmem:[#allocation9 + $0x50] ss:$8 sps:$4 sm:$0xff]   ;;  %v2619_v20 = vld [vmem:[#allocation9 + $0x64] ss:$8 sps:$4 sm:$0xff]   ;;  %v2621_v22 = vld [vmem:[#allocation9 + $0x60] ss:$8 sps:$4 sm:$0xff]  }
  0xf4   : > { %2396 = vmatprep.subr.bf16.mxu0 %v3031_v0  ;;  %v2618_v21 = vld [vmem:[#allocation8 + $0x30] sm:$0xff]   ;;  %v2622_v24 = vld [vmem:[#allocation8 + $0x38] sm:$0xff]   ;;  %v485_v27 = vld [vmem:[%s3363_s17] sm:$0xf]  ;;  %v3417_v31 = vsub.s32 0, %v3414_v30  ;;  %v3431_v36 = vsub.s32 1, %v3414_v30 }
  0xf5   : > { %708 = vmatpush1.bf16.msra.mxu1 %v2601_v7  ;;  %v2623_v23 = vld [vmem:[#allocation9 + $0x74] ss:$8 sps:$4 sm:$0xff]   ;;  %v2625_v25 = vld [vmem:[#allocation9 + $0x70] ss:$8 sps:$4 sm:$0xff]   ;;  %v3422_v32 = vld [vmem:[%s3590_s7] sm:$0x7f] }
  0xf6   : > { %709 = vmatprep.subr.bf16.mxu1 %v2603_v9  ;;  %v3402_v26 = vld [vmem:[%s3373_s10] sm:$0xff]  ;;  %v613_v33 = vld [vmem:[%s3591_s8] sm:$0x3]  ;;  %v508_v34 = vrot.slane %v3422_v32, %v3417_v31  ;;  %s3035_s25 = smov 64   ;;  %vm812_vm2 = vcmask 1043456   ;;  %s3036_s30 = smov 32  }
  0xf7   : > { %2397 = vmatpush3.bf16.msra.mxu0 %v2602_v8  ;;  %v487_v28 = vpack.c.bf16 %v3402_v26, %v3402_v26  ;;  %v618_v35 = vrot.slane %v613_v33, %v3417_v31  ;;  %v622_v44 = vrot.slane %v613_v33, %v3431_v36  ;;  %vm796_vm3 = vcmask 64512   ;;  %s3632_s28 = sld [smem:[#allocation26_spill]]  ;;  %s2308_s22 = sshll.u32 %s3114_s19, 7 }
  0xf8   : > { %2398 = vmatprep.subr.bf16.mxu0 %v3031_v0  ;;  %vm858_vm4 = vcmask 257024   ;;  %vm981_vm5 = vcmask 519424   ;;  %vm1101_vm6 = vcmask 781824   ;;  %vm1221_vm7 = vcmask 1044224   ;;  %s483_s17 = scalar_lea.vmem [#allocation15], %s2193_s20  ;;  %s3633_s12 = sld [smem:[#allocation27_spill]] }
  0xf9   : > { %710 = vmatpush1.bf16.msra.mxu1 %v2605_v10  ;;  %s2039_s0 = sshll.u32 %s483_s17, 4  ;;  %s2026_s18 = scalar_lea.sflag [#allocation5], %s3359_s4  ;;  %s3541_s0 = int_to_ptr.vmem [resolvable:$true] %s2039_s0 }
  0xfa   : > { %711 = vmatprep.subr.bf16.mxu1 %v2607_v11  ;;  %s2934_s23 = scalar_lea.vmem %s3541_s0, 128  ;;  %p3634_p13 = scmp.ne.s32.totalorder %s3619_s26, 0 }
  0xfb   : > { %2399 = vmatpush3.bf16.msra.mxu0 %v2606_v12  ;;  %p2935_p12 = scmp.ne.s32.totalorder %s3541_s0, %s2934_s23  ;;  %s3037_s19 = smov [#allocation15]  }
  0xfc   : > { %2400 = vmatprep.subr.bf16.mxu0 %v3031_v0  ;;  %s2938_s20 = sshll.u32 %s3037_s19, 4  ;;  %s2939_s20 = int_to_ptr.vmem [resolvable:$false] %s2938_s20 }
  0xfd   : > { %712 = vmatpush1.bf16.msra.mxu1 %v2609_v13  ;;  %p2936_p6 = pnand %p2935_p12, %p3634_p13  ;;  %p2941_p0 = scmp.lt.s32.totalorder %s3541_s0, %s2939_s20 }
  0xfe   : > { %713 = vmatprep.subr.bf16.mxu1 %v2611_v14  ;;  %s3539_s24 = scalar_lea.hbm %s3633_s12, %s2308_s22 }
  0xff   : > { %2401 = vmatpush3.bf16.msra.mxu0 %v2610_v15  ;;  %p2937_p9 = pneg %p2936_p6 }
 0x100   : > { %2402 = vmatprep.subr.bf16.mxu0 %v3031_v0 }
 0x101   : > { %714 = vmatpush1.bf16.msra.mxu1 %v2613_v16 }
 0x102   : > { %715 = vmatprep.subr.bf16.mxu1 %v2615_v17 }
 0x103   : > { %2403 = vmatpush3.bf16.msra.mxu0 %v2614_v18 }
 0x104   : > { %2404 = vmatprep.subr.bf16.mxu0 %v3031_v0 }
 0x105   : > { %716 = vmatpush1.bf16.msra.mxu1 %v2617_v19 }
 0x106   : > { %717 = vmatprep.subr.bf16.mxu1 %v2619_v20 }
 0x107   : > { %2405 = vmatpush3.bf16.msra.mxu0 %v2618_v21 }
 0x108   : > { %2406 = vmatprep.subr.bf16.mxu0 %v3031_v0 }
 0x109   : > { %718 = vmatpush1.bf16.msra.mxu1 %v2621_v22 }
 0x10a   : > { %719 = vmatprep.subr.bf16.mxu1 %v2623_v23 }
 0x10b   : > { %2407 = vmatpush3.bf16.msra.mxu0 %v2622_v24 }
 0x10c   : > { %2436 = vmatprep.subr.bf16.mxu0 %v3031_v0 }
 0x10d   : > { %720 = vmatpush1.bf16.msra.mxu1 %v2625_v25 }
 0x10e   : > { %2409 = vmatmul.mubr.bf16.vlgmr.msra.gmra.mrb[0].mxu0 %v485_v27  ;;  %2412 = vmatprep.subr.bf16.mxu1 %v3031_v0 }
 0x10f   : > { %2438 = vmatprep.mubr.msk.bf16.mxu0 %vm3032_vm0, %v3031_v0 }
 0x110   : > { %738 = vmatmul.mubr.bf16.vlgmr.msra.gmra.mrb[0].mxu1 %v487_v28 }
 0x111   : > { %2414 = vmatprep.mubr.msk.bf16.mxu1 %vm3032_vm0, %v3031_v0 }
 0x1e1   : > { %v591_v37 = vpop.f32.mrb[0].mxu0 }
 0x1e2   : > { %v592_v38 = vadd.f32 %v591_v37, %v508_v34  ;;  %v2410_v39 = vpop.f32.mrb[1].mxu0 }
 0x1e3   : > { %v739_v40 = vpop.f32.mrb[0].mxu1  ;;  %v594_v41 = vpop.f32.mrb[2].mxu0 }
 0x1e4   : > { %v746_v42 = vpack.c.bf16 %v592_v38, %v592_v38  ;;  %v740_v43 = vadd.f32 %v739_v40, %v618_v35  ;;  %v741_v45 = vpop.f32.mrb[1].mxu1  ;;  %v2411_v46 = vpop.f32.mrb[3].mxu0 }
 0x1e5   : > { %v743_v47 = vpop.f32.mrb[2].mxu1  ;;  %v742_v50 = vadd.f32 %v741_v45, %v622_v44 }
 0x1e6   : > { %v747_v48 = vpack.c.bf16 %v740_v43, %v740_v43  ;;  %v744_v49 = vpop.f32.mrb[3].mxu1  ;;  %861 = vrot.lane.b32.xlu1 %v746_v42, %s3034_s9 }
 0x1e7   : > { %v3438_v52 = vpack.c.bf16 %v742_v50, %v742_v50 }
 0x1e8   : > { %v754_v51 = vsel %vm749_vm1, %v747_v48, 0 }
 0x1e9   : > { %2413 = vmatpush3.bf16.xpose.msra.mxu1 %v754_v51  ;;  %v814_v53 = vsel %vm812_vm2, %v3438_v52, 0 }
 0x1ea   : > { %985 = vrot.lane.b32.xlu1 %v747_v48, %s3035_s25  ;;  %2418 = vmatprep.subr.bf16.mxu1 %v3031_v0 }
 0x1ee   : > { %983 = vrot.lane.b32.xlu1 %v746_v42, %s3035_s25 }
 0x1f0   : > { %2415 = vmatmul.mubr.msk.bf16.vlgmr.msra.gmra.mrb[4].mxu1 %vm749_vm1, %v746_v42 }
 0x1f1   : > { %2419 = vmatpush3.bf16.msra.mxu1 %v814_v53  ;;  %2420 = vmatprep.mubr.msk.bf16.mxu1 %vm3032_vm0, %v3031_v0 }
 0x1f2   : > { %1105 = vrot.lane.b32.xlu1 %v747_v48, %s3036_s30  ;;  %2424 = vmatprep.subr.bf16.mxu1 %v3031_v0 }
 0x1f6   : > { %1103 = vrot.lane.b32.xlu1 %v746_v42, %s3036_s30 }
 0x258   : > { %v862_v54 = vpop.permute.xlu1 %861 }
 0x25c   : > { %v986_v55 = vpop.permute.xlu1 %985 }
 0x25d   : > { %v991_v56 = vsel %vm749_vm1, %v986_v55, 0 }
 0x25e   : > { %2437 = vmatpush3.bf16.xpose.msra.mxu0 %v991_v56 }
 0x25f   : > { %2448 = vmatprep.subr.bf16.mxu0 %v3031_v0 }
 0x260   : > { %v984_v57 = vpop.permute.xlu1 %983 }
 0x264   : > { %v1106_v58 = vpop.permute.xlu1 %1105 }
 0x265   : > { %v1111_v59 = vsel %vm749_vm1, %v1106_v58, 0  ;;  %2439 = vmatmul.mubr.msk.bf16.vlgmr.msra.gmra.mrb[4].mxu0 %vm749_vm1, %v984_v57 }
 0x266   : > { %2449 = vmatpush3.bf16.xpose.msra.mxu0 %v1111_v59  ;;  %2450 = vmatprep.mubr.msk.bf16.mxu0 %vm3032_vm0, %v3031_v0 }
 0x267   : > { %2460 = vmatprep.subr.bf16.mxu0 %v3031_v0 }
 0x268   : > { %v1104_v60 = vpop.permute.xlu1 %1103 }
 0x26d   : > { %2451 = vmatmul.mubr.msk.bf16.vlgmr.msra.gmra.mrb[8].mxu0 %vm749_vm1, %v1104_v60  ;;  %v2626_v60 = vld [vmem:[#allocation11] sm:$0xff]  }
 0x26e   : > { %2476 = vmatprep.mubr.msk.bf16.mxu0 %vm3032_vm0, %v3031_v0  ;;  %2461 = vmatpush3.bf16.msra.mxu0 %v2626_v60 }
 0x26f   : > { %2462 = vmatprep.subr.bf16.mxu0 %v3031_v0 }
 0x2c3   : > { %v790_v61 = vpop.f32.mrb[4].mxu1 }
 0x2c4   : > { %v2416_v62 = vpop.f32.mrb[5].mxu1  ;;  %v797_v63 = vsel %vm796_vm3, %v790_v61, -inf }
 0x2c5   : > { %798 = vmax.xlane.f32.xlu0 %v797_v63  ;;  %v793_v2 = vpop.f32.mrb[6].mxu1 }
 0x2c6   : > { %v2417_v3 = vpop.f32.mrb[7].mxu1 }
 0x2db   : > { %864 = vrot.lane.b32.xlu0 %v747_v48, %s3034_s9 }
 0x338   : > { %v1027_v4 = vpop.f32.mrb[4].mxu0 }
 0x339   : > { %v2440_v5 = vpop.f32.mrb[5].mxu0  ;;  %v1033_v6 = vsel %vm796_vm3, %v1027_v4, -inf }
 0x33a   : > { %1034 = vmax.xlane.f32.xlu0 %v1033_v6  ;;  %v1030_v7 = vpop.f32.mrb[6].mxu0  ;;  %v2628_v6 = vld [vmem:[#allocation11 + $0x10] sm:$0xff]  }
 0x33b   : > { %v2441_v8 = vpop.f32.mrb[7].mxu0  ;;  %v2629_v7 = vld [vmem:[#allocation11 + $0x18] sm:$0xff]  }
 0x340   : > { %v1147_v9 = vpop.f32.mrb[8].mxu0 }
 0x341   : > { %v2452_v10 = vpop.f32.mrb[9].mxu0  ;;  %v1153_v11 = vsel %vm796_vm3, %v1147_v9, -inf }
 0x342   : > { %1154 = vmax.xlane.f32.xlu1 %v1153_v11  ;;  %v1150_v12 = vpop.f32.mrb[10].mxu0  ;;  %v2630_v11 = vld [vmem:[#allocation11 + $0x20] sm:$0xff]  }
 0x343   : > { %v2453_v13 = vpop.f32.mrb[11].mxu0 }
 0x350   : > { %925 = vrot.lane.b32.xlu0 %v3438_v52, %s3034_s9 }
 0x352   : > { %v799_v14 = vpop.xlane.xlu0 %798 }
 0x353   : > { %v800_v15 = vsub.f32 %v790_v61, %v799_v14  ;;  %v2627_v61 = vld [vmem:[#allocation11 + $0x8] sm:$0xff]  }
 0x354   : > { %2463 = vmatpush3.bf16.msra.mxu0 %v2627_v61 }
 0x355   : > { %v801_v16 = vmul.f32 1.442695, %v800_v15  ;;  %2464 = vmatprep.subr.bf16.mxu0 %v3031_v0  ;;  %v2631_v15 = vld [vmem:[#allocation11 + $0x28] sm:$0xff]  }
 0x356   : > { %v865_v18 = vpop.permute.xlu0 %864 }
 0x357   : > { %2714 = vpow2.f32 %v801_v16  ;;  %v870_v20 = vsel %vm749_vm1, %v865_v18, 0 }
 0x358   : > { %2465 = vmatpush3.bf16.msra.mxu0 %v2628_v6  ;;  %v2663_v6 = vld [vmem:[#allocation12 + $0x8c] ss:$16 sps:$4 sm:$0xff]  }
 0x359   : > { %2466 = vmatprep.subr.bf16.mxu0 %v3031_v0 }
 0x35c   : > { %2467 = vmatpush3.bf16.msra.mxu0 %v2629_v7  ;;  %v2658_v7 = vld [vmem:[#allocation12 + $0x80] ss:$16 sps:$4 sm:$0xff]  }
 0x35d   : > { %2468 = vmatprep.subr.bf16.mxu0 %v3031_v0 }
 0x360   : > { %2469 = vmatpush3.bf16.msra.mxu0 %v2630_v11  ;;  %v2664_v11 = vld [vmem:[#allocation12 + $0xa0] ss:$16 sps:$4 sm:$0xff]  }
 0x361   : > { %v2715_v17 = vpop.eup %2714  ;;  %2470 = vmatprep.subr.bf16.mxu0 %v3031_v0 }
 0x362   : > { %v808_v19 = vpack.c.bf16 %v2715_v17, %v2715_v17  ;;  %v803_v56 = vsel %vm796_vm3, %v2715_v17, 0.0 }
 0x364   : > { %2421 = vmatmul.mubr.msk.bf16.vlgmr.msra.gmra.mrb[8].mxu1 %vm796_vm3, %v808_v19  ;;  %2471 = vmatpush3.bf16.msra.mxu0 %v2631_v15  ;;  %v2670_v15 = vld [vmem:[#allocation12 + $0xc0] ss:$16 sps:$4 sm:$0xff]  }
 0x365   : > { %2425 = vmatpush3.bf16.xpose.msra.mxu1 %v870_v20  ;;  %2426 = vmatprep.mubr.msk.bf16.mxu1 %vm3032_vm0, %v3031_v0  ;;  %v2632_v20 = vld [vmem:[#allocation11 + $0x30] sm:$0xff]  }
 0x366   : > { %2430 = vmatprep.subr.bf16.mxu1 %v3031_v0  ;;  %2472 = vmatprep.subr.bf16.mxu0 %v3031_v0 }
 0x368   : > { %2473 = vmatpush3.bf16.msra.mxu0 %v2632_v20  ;;  %v2679_v20 = vld [vmem:[#allocation12 + $0xe8] ss:$16 sps:$4 sm:$0xff]  }
 0x369   : > { %2474 = vmatprep.subr.bf16.mxu0 %v3031_v0 }
 0x36c   : > { %2427 = vmatmul.mubr.msk.bf16.vlgmr.msra.gmra.mrb[12].mxu1 %vm749_vm1, %v862_v54 }
 0x36d   : > { %2432 = vmatprep.mubr.msk.bf16.mxu1 %vm3032_vm0, %v3031_v0 }
 0x3c7   : > { %v1035_v21 = vpop.xlane.xlu0 %1034 }
 0x3c8   : > { %v1036_v22 = vsub.f32 %v1027_v4, %v1035_v21 }
 0x3ca   : > { %v1037_v39 = vmul.f32 1.442695, %v1036_v22 }
 0x3cb   : > { %v926_v23 = vpop.permute.xlu0 %925 }
 0x3cc   : > { %v931_v24 = vsel %vm812_vm2, %v926_v23, 0  ;;  %2716 = vpow2.f32 %v1037_v39 }
 0x3cd   : > { %2431 = vmatpush3.bf16.msra.mxu1 %v931_v24  ;;  %v2633_v24 = vld [vmem:[#allocation11 + $0x38] sm:$0xff]  }
 0x3ce   : > { %2442 = vmatprep.subr.bf16.mxu1 %v3031_v0  ;;  %2475 = vmatpush3.bf16.msra.mxu0 %v2633_v24 }
 0x3cf   : > { %v1155_v42 = vpop.xlane.xlu1 %1154 }
 0x3d0   : > { %v1156_v43 = vsub.f32 %v1147_v9, %v1155_v42  ;;  %v1243_v42 = vrot.slane %v3422_v32, %v3431_v36 }
 0x3d2   : > { %v1157_v46 = vmul.f32 1.442695, %v1156_v43 }
 0x3d6   : > { %v2717_v40 = vpop.eup %2716 }
 0x3d7   : > { %v1039_v41 = vsel %vm796_vm3, %v2717_v40, 0.0  ;;  %v1044_v57 = vpack.c.bf16 %v2717_v40, %v2717_v40 }
 0x437   : > { %v850_v25 = vpop.f32.mrb[8].mxu1 }
 0x438   : > { %v2422_v27 = vpop.f32.mrb[9].mxu1 }
 0x439   : > { %v853_v28 = vpop.f32.mrb[10].mxu1 }
 0x43a   : > { %v2423_v29 = vpop.f32.mrb[11].mxu1 }
 0x43f   : > { %v906_v33 = vpop.f32.mrb[12].mxu1 }
 0x440   : > { %v2428_v34 = vpop.f32.mrb[13].mxu1  ;;  %v912_v35 = vsel %vm796_vm3, %v906_v33, -inf }
 0x441   : > { %v909_v37 = vpop.f32.mrb[14].mxu1  ;;  %913 = vmax.xlane.f32.xlu1 %v912_v35 }
 0x442   : > { %v2429_v38 = vpop.f32.mrb[15].mxu1 }
 0x452   : > { %1045 = vrot.lane.b32.xlu1 %v3438_v52, %s3035_s25 }
 0x456   : > { %1165 = vrot.lane.b32.xlu1 %v3438_v52, %s3036_s30 }
 0x47a   : > { %1040 = vadd.xlane.f32.xlu1 %v1039_v41 }
 0x4ce   : > { %v914_v44 = vpop.xlane.xlu1 %913 }
 0x4cf   : > { %v915_v45 = vsub.f32 %v906_v33, %v914_v44 }
 0x4d1   : > { %v916_v47 = vmul.f32 1.442695, %v915_v45 }
 0x4d2   : > { %v1046_v49 = vpop.permute.xlu1 %1045 }
 0x4d3   : > { %2718 = vpow2.f32 %v916_v47  ;;  %v1051_v53 = vsel %vm812_vm2, %v1046_v49, 0  ;;  %v2634_v49 = vld [vmem:[#allocation12] ss:$16 sps:$4 sm:$0xff]  }
 0x4d4   : > { %2720 = vpow2.f32 %v1157_v46 }
 0x4d6   : > { %v1166_v55 = vpop.permute.xlu1 %1165 }
 0x4d7   : > { %v1171_v58 = vsel %vm812_vm2, %v1166_v55, 0  ;;  %v2643_v55 = vld [vmem:[#allocation12 + $0x28] ss:$16 sps:$4 sm:$0xff]  }
 0x4dd   : > { %v2719_v48 = vpop.eup %2718 }
 0x4de   : > { %v918_v50 = vsel %vm796_vm3, %v2719_v48, 0.0  ;;  %v923_v51 = vpack.c.bf16 %v2719_v48, %v2719_v48  ;;  %v2721_v52 = vpop.eup %2720 }
 0x4df   : > { %919 = vadd.xlane.f32.xlu0 %v918_v50  ;;  %v1159_v54 = vsel %vm796_vm3, %v2721_v52, 0.0  ;;  %v1164_v59 = vpack.c.bf16 %v2721_v52, %v2721_v52  ;;  %v2636_v50 = vld [vmem:[#allocation12 + $0x4] ss:$16 sps:$4 sm:$0xff]   ;;  %v2639_v52 = vld [vmem:[#allocation12 + $0xc] ss:$16 sps:$4 sm:$0xff]  }
 0x4e0   : > { %2433 = vmatmul.mubr.msk.bf16.vlgmr.msra.gmra.mrb[16].mxu1 %vm796_vm3, %v923_v51  ;;  %v2637_v51 = vld [vmem:[#allocation12 + $0x8] ss:$16 sps:$4 sm:$0xff]   ;;  %1616 = vmatprep.subr.bf16.mxu0 %v2639_v52 }
 0x4e1   : > { %2443 = vmatpush3.bf16.msra.mxu1 %v1051_v53  ;;  %2444 = vmatprep.mubr.msk.bf16.mxu1 %vm3032_vm0, %v3031_v0  ;;  %v2642_v53 = vld [vmem:[#allocation12 + $0x24] ss:$16 sps:$4 sm:$0xff]   ;;  %v2697_v52 = vld [vmem:[#allocation14 + $0x98] sm:$0xff]  }
 0x4e2   : > { %2454 = vmatprep.subr.bf16.mxu1 %v3031_v0 }
 0x4e3   : > { %1160 = vadd.xlane.f32.xlu0 %v1159_v54  ;;  %v2645_v54 = vld [vmem:[#allocation12 + $0x2c] ss:$16 sps:$4 sm:$0xff]  }
 0x4e7   : > { %804 = vadd.xlane.f32.xlu0 %v803_v56  ;;  %v2648_v56 = vld [vmem:[#allocation12 + $0x44] ss:$16 sps:$4 sm:$0xff]  }
 0x4e8   : > { %2445 = vmatmul.mubr.msk.bf16.vlgmr.msra.gmra.mrb[20].mxu1 %vm796_vm3, %v1044_v57  ;;  %v2651_v57 = vld [vmem:[#allocation12 + $0x4c] ss:$16 sps:$4 sm:$0xff]  }
 0x4e9   : > { %2455 = vmatpush3.bf16.msra.mxu1 %v1171_v58  ;;  %2456 = vmatprep.mubr.msk.bf16.mxu1 %vm3032_vm0, %v3031_v0  ;;  %v2646_v58 = vld [vmem:[#allocation12 + $0x40] ss:$16 sps:$4 sm:$0xff]  }
 0x4ea   : > { %1575 = vmatprep.subr.bf16.mxu1 %v2636_v50  ;;  %v2695_v50 = vld [vmem:[#allocation14 + $0xd8] sm:$0xff]  }
 0x4f0   : > { %2457 = vmatmul.mubr.msk.bf16.vlgmr.msra.gmra.mrb[24].mxu1 %vm796_vm3, %v1164_v59 }
 0x4f1   : > { %1607 = vmatprep.mubr.bf16.mxu1 %v3033_v1  ;;  %1576 = vmatpush1.bf16.msra.mxu1 %v2634_v49  ;;  %v2694_v49 = vld [vmem:[#allocation14 + $0x58] sm:$0xff]  }
 0x4f2   : > { %1577 = vmatprep.subr.bf16.mxu1 %v2642_v53  ;;  %v2698_v53 = vld [vmem:[#allocation14 + $0x60] sm:$0xff]  }
 0x507   : > { %v1041_v8 = vpop.xlane.xlu1 %1040 }
 0x56c   : > { %v920_v62 = vpop.xlane.xlu0 %919 }
 0x570   : > { %v1161_v63 = vpop.xlane.xlu0 %1160 }
 0x574   : > { %v805_v2 = vpop.xlane.xlu0 %804 }
 0x575   : > { %2722 = vrcp.f32 %v805_v2  ;;  %v2657_v2 = vld [vmem:[#allocation12 + $0x6c] ss:$16 sps:$4 sm:$0xff]  }
 0x576   : > { %2724 = vrcp.f32 %v920_v62 }
 0x577   : > { %2726 = vrcp.f32 %v1041_v8  ;;  %v2661_v8 = vld [vmem:[#allocation12 + $0x88] ss:$16 sps:$4 sm:$0xff]  }
 0x578   : > { %2728 = vrcp.f32 %v1161_v63  ;;  %v2654_v63 = vld [vmem:[#allocation12 + $0x64] ss:$16 sps:$4 sm:$0xff]  }
 0x57f   : > { %v2723_v3 = vpop.eup %2722 }
 0x580   : > { %v856_v4 = vmul.f32 %v2723_v3, %v850_v25  ;;  %v2725_v9 = vpop.eup %2724  ;;  %v2652_v3 = vld [vmem:[#allocation12 + $0x60] ss:$16 sps:$4 sm:$0xff]  }
 0x581   : > { %v2727_v18 = vpop.eup %2726 }
 0x582   : > { %v857_v5 = vpack.c.bf16 %v856_v4, %v856_v4  ;;  %v2729_v28 = vpop.eup %2728  ;;  %v2655_v4 = vld [vmem:[#allocation12 + $0x68] ss:$16 sps:$4 sm:$0xff]  }
 0x584   : > { %859 = vst.msk [vmem:[#allocation2] sm:$0xf] %vm858_vm4, %v857_v5  ;;  %v2660_v5 = vld [vmem:[#allocation12 + $0x84] ss:$16 sps:$4 sm:$0xff]  }
 0x5b3   : > { %v967_v10 = vpop.f32.mrb[16].mxu1 }
 0x5b4   : > { %v973_v12 = vmul.f32 %v2725_v9, %v967_v10  ;;  %v2434_v13 = vpop.f32.mrb[17].mxu1  ;;  %v2666_v9 = vld [vmem:[#allocation12 + $0xa4] ss:$16 sps:$4 sm:$0xff]   ;;  %v2669_v10 = vld [vmem:[#allocation12 + $0xac] ss:$16 sps:$4 sm:$0xff]  }
 0x5b5   : > { %v970_v14 = vpop.f32.mrb[18].mxu1  ;;  %v2672_v13 = vld [vmem:[#allocation12 + $0xc4] ss:$16 sps:$4 sm:$0xff]  }
 0x5b6   : > { %v2311_v16 = vpack.c.bf16 %v973_v12, %v973_v12  ;;  %v2435_v17 = vpop.f32.mrb[19].mxu1  ;;  %v2667_v12 = vld [vmem:[#allocation12 + $0xa8] ss:$16 sps:$4 sm:$0xff]   ;;  %v2675_v14 = vld [vmem:[#allocation12 + $0xcc] ss:$16 sps:$4 sm:$0xff]  }
 0x5b7   : > { %v2678_v17 = vld [vmem:[#allocation12 + $0xe4] ss:$16 sps:$4 sm:$0xff]  }
 0x5b8   : > { %978 = vrot.lane.b32.xlu1 %v2311_v16, %s3036_s30  ;;  %v2673_v16 = vld [vmem:[#allocation12 + $0xc8] ss:$16 sps:$4 sm:$0xff]  }
 0x5bb   : > { %v1087_v19 = vpop.f32.mrb[20].mxu1 }
 0x5bc   : > { %v1093_v21 = vmul.f32 %v2727_v18, %v1087_v19  ;;  %v2446_v22 = vpop.f32.mrb[21].mxu1  ;;  %v2681_v18 = vld [vmem:[#allocation12 + $0xec] ss:$16 sps:$4 sm:$0xff]   ;;  %v2676_v19 = vld [vmem:[#allocation12 + $0xe0] ss:$16 sps:$4 sm:$0xff]  }
 0x5bd   : > { %v1090_v23 = vpop.f32.mrb[22].mxu1  ;;  %v2683_v22 = vld [vmem:[#allocation14 + $0xc0] sm:$0xff]  }
 0x5be   : > { %v2312_v25 = vpack.c.bf16 %v1093_v21, %v1093_v21  ;;  %v2447_v27 = vpop.f32.mrb[23].mxu1  ;;  %v2682_v21 = vld [vmem:[#allocation14 + $0x40] sm:$0xff]  }
 0x5bf   : > { %v1347_v27 = vsub.s32 3, %v3414_v30 }
 0x5c0   : > { %1098 = vrot.lane.b32.xlu0 %v2312_v25, %s3035_s25 }
 0x5c3   : > { %v1207_v29 = vpop.f32.mrb[24].mxu1 }
 0x5c4   : > { %v1213_v33 = vmul.f32 %v2729_v28, %v1207_v29  ;;  %v2458_v34 = vpop.f32.mrb[25].mxu1  ;;  %v1352_v28 = vsub.s32 4, %v3414_v30  ;;  %v1348_v29 = vrot.slane %v3422_v32, %v1347_v27 }
 0x5c5   : > { %v1210_v35 = vpop.f32.mrb[26].mxu1 }
 0x5c6   : > { %v2313_v37 = vpack.c.bf16 %v1213_v33, %v1213_v33  ;;  %v2459_v38 = vpop.f32.mrb[27].mxu1  ;;  %v1353_v35 = vrot.slane %v3422_v32, %v1352_v28 }
 0x5c8   : > { %1218 = vrot.lane.b32.xlu1 %v2313_v37, %s3034_s9  ;;  %s2940_s9 = scalar_lea.vmem %s2939_s20, 256 }
 0x5c9   : > { %p2942_p5 = scmp.lt.s32.totalorder %s2940_s9, %s2934_s23 }
 0x5cb   : > { %p2943_p3 = por %p2942_p5, %p2941_p0 }
 0x5cd   : > { %p2944_p2 = pnand %p2943_p3, %p2937_p9 }
 0x62a   : > { %v979_v39 = vpop.permute.xlu1 %978 }
 0x62b   : > { %982 = vst.msk [vmem:[#allocation2] sm:$0xf] %vm981_vm5, %v979_v39  ;;  %v2684_v39 = vld [vmem:[#allocation14] sm:$0xff]  }
 0x632   : > { %v1099_v40 = vpop.permute.xlu0 %1098 }
 0x633   : > { %1102 = vst.msk [vmem:[#allocation2] sm:$0xf] %vm1101_vm6, %v1099_v40  ;;  %v2685_v40 = vld [vmem:[#allocation14 + $0x80] sm:$0xff]  }
 0x63a   : > { %v1219_v0 = vpop.permute.xlu1 %1218 }
 0x63b   : > { %1222 = vst.msk [vmem:[#allocation2] sm:$0xf] %vm1221_vm7, %v1219_v0 }
 0x642   : > { %v1223_v41 = vld [vmem:[#allocation2] sm:$0xf] }
 0x643   : > { %2477 = vmatmul.mubr.bf16.vlgmr.msra.gmra.mrb[12].mxu0 %v1223_v41  ;;  %v2686_v41 = vld [vmem:[#allocation14 + $0x48] sm:$0xff]  }
 0x644   : > { %1648 = vmatprep.mubr.bf16.mxu0 %v3033_v1  ;;  %v2640_v1 = vld [vmem:[#allocation12 + $0x20] ss:$16 sps:$4 sm:$0xff]   ;;  %1617 = vmatpush1.bf16.msra.mxu0 %v2637_v51  ;;  %v2696_v51 = vld [vmem:[#allocation14 + $0x18] sm:$0xff]  }
 0x645   : > { %1618 = vmatprep.subr.bf16.mxu0 %v2645_v54  ;;  %1578 = vmatpush1.bf16.msra.mxu1 %v2640_v1  ;;  %v2699_v54 = vld [vmem:[#allocation14 + $0xe0] sm:$0xff]  }
 0x646   : > { %1579 = vmatprep.subr.bf16.mxu1 %v2648_v56  ;;  %v2700_v1 = vld [vmem:[#allocation14 + $0x20] sm:$0xff]   ;;  %v2702_v56 = vld [vmem:[#allocation14 + $0x68] sm:$0xff]  }
 0x648   : > { %1619 = vmatpush1.bf16.msra.mxu0 %v2643_v55  ;;  %v2701_v55 = vld [vmem:[#allocation14 + $0xa0] sm:$0xff]  }
 0x649   : > { %1620 = vmatprep.subr.bf16.mxu0 %v2651_v57  ;;  %1580 = vmatpush1.bf16.msra.mxu1 %v2646_v58  ;;  %v2703_v57 = vld [vmem:[#allocation14 + $0xe8] sm:$0xff]  }
 0x64a   : > { %1581 = vmatprep.subr.bf16.mxu1 %v2654_v63  ;;  %v2704_v58 = vld [vmem:[#allocation14 + $0x28] sm:$0xff]   ;;  %v2710_v63 = vld [vmem:[#allocation14 + $0x78] sm:$0xff]  }
 0x64d   : > { %1582 = vmatpush1.bf16.msra.mxu1 %v2652_v3  ;;  %v2712_v3 = vld [vmem:[#allocation14 + $0x38] sm:$0xff]  }
 0x64e   : > { %1583 = vmatprep.subr.bf16.mxu1 %v2660_v5  ;;  %v1358_v5 = vsub.s32 2, %v3414_v30 }
 0x651   : > { %1584 = vmatpush1.bf16.msra.mxu1 %v2658_v7 }
 0x652   : > { %1585 = vmatprep.subr.bf16.mxu1 %v2666_v9 }
 0x655   : > { %1586 = vmatpush1.bf16.msra.mxu1 %v2664_v11 }
 0x656   : > { %1587 = vmatprep.subr.bf16.mxu1 %v2672_v13 }
 0x659   : > { %1588 = vmatpush1.bf16.msra.mxu1 %v2670_v15 }
 0x65a   : > { %1589 = vmatprep.subr.bf16.mxu1 %v2678_v17 }
 0x65d   : > { %1590 = vmatpush1.bf16.msra.mxu1 %v2676_v19 }
 0x65e   : > { %2348 = vmatprep.subr.bf16.mxu1 %v2682_v21 }
 0x716   : > { %v1326_v43 = vpop.f32.mrb[12].mxu0 }
 0x717   : > { %v1327_v44 = vadd.f32 %v1326_v43, %v1243_v42  ;;  %v2478_v45 = vpop.f32.mrb[13].mxu0  ;;  %v2687_v42 = vld [vmem:[#allocation14 + $0xc8] sm:$0xff]  }
 0x718   : > { %v1329_v46 = vpop.f32.mrb[14].mxu0  ;;  %v2688_v43 = vld [vmem:[#allocation14 + $0x8] sm:$0xff]   ;;  %v2690_v45 = vld [vmem:[#allocation14 + $0x50] sm:$0xff]  }
 0x719   : > { %v2479_v47 = vpop.f32.mrb[15].mxu0  ;;  %v1332_v48 = vadd.f32 %v1327_v44, %v3402_v26  ;;  %v2649_v26 = vld [vmem:[#allocation12 + $0x48] ss:$16 sps:$4 sm:$0xff]   ;;  %v2691_v46 = vld [vmem:[#allocation14 + $0xd0] sm:$0xff]  }
 0x71a   : > { %1621 = vmatpush1.bf16.msra.mxu0 %v2649_v26  ;;  %v2689_v44 = vld [vmem:[#allocation14 + $0x88] sm:$0xff]   ;;  %v2692_v47 = vld [vmem:[#allocation14 + $0x10] sm:$0xff]  }
 0x71b   : > { %1333 = vadd.xlane.f32.xlu1 %v1332_v48  ;;  %1622 = vmatprep.subr.bf16.mxu0 %v2657_v2  ;;  %v2705_v26 = vld [vmem:[#allocation14 + $0xa8] sm:$0xff]   ;;  %v2711_v2 = vld [vmem:[#allocation14 + $0xf8] sm:$0xff]  }
 0x71e   : > { %1623 = vmatpush1.bf16.msra.mxu0 %v2655_v4  ;;  %v2713_v4 = vld [vmem:[#allocation14 + $0xb8] sm:$0xff]  }
 0x71f   : > { %1624 = vmatprep.subr.bf16.mxu0 %v2663_v6  ;;  %v1393_v6 = vld [vmem:[%s3632_s28] sm:$0xf] }
 0x720   : > { %v1398_v7 = vrot.slane %v1393_v6, %v3417_v31  ;;  %v1402_v9 = vrot.slane %v1393_v6, %v3431_v36 }
 0x722   : > { %1625 = vmatpush1.bf16.msra.mxu0 %v2661_v8  ;;  %v1406_v8 = vrot.slane %v1393_v6, %v1358_v5 }
 0x723   : > { %1626 = vmatprep.subr.bf16.mxu0 %v2669_v10  ;;  %v1410_v10 = vrot.slane %v1393_v6, %v1347_v27 }
 0x726   : > { %1627 = vmatpush1.bf16.msra.mxu0 %v2667_v12 }
 0x727   : > { %1628 = vmatprep.subr.bf16.mxu0 %v2675_v14 }
 0x72a   : > { %1629 = vmatpush1.bf16.msra.mxu0 %v2673_v16 }
 0x72b   : > { %1630 = vmatprep.subr.bf16.mxu0 %v2681_v18 }
 0x72e   : > { %1631 = vmatpush1.bf16.msra.mxu0 %v2679_v20 }
 0x72f   : > { %2370 = vmatprep.subr.bf16.mxu0 %v2683_v22 }
 0x7a8   : > { %v1334_v59 = vpop.xlane.xlu1 %1333 }
 0x7a9   : > { %v1336_v60 = vmul.f32 0.0078125, %v1334_v59  ;;  %v2706_v59 = vld [vmem:[#allocation14 + $0x70] sm:$0xff]  }
 0x7ab   : > { %v1337_v61 = vsub.f32 %v1332_v48, %v1336_v60  ;;  %v2693_v48 = vld [vmem:[#allocation14 + $0x90] sm:$0xff]  }
 0x7ac   : > { %v2707_v60 = vld [vmem:[#allocation14 + $0xf0] sm:$0xff]  }
 0x7ad   : > { %v1338_v62 = vmul.f32 %v1337_v61, %v1337_v61 }
 0x7af   : > { %1339 = vadd.xlane.f32.xlu0 %v1338_v62  ;;  %v2709_v62 = vld [vmem:[#allocation14 + $0xb0] sm:$0xff]  }
 0x83c   : > { %v1340_v23 = vpop.xlane.xlu0 %1339 }
 0x83d   : > { %v1341_v24 = vmul.f32 0.0078125, %v1340_v23 }
 0x83f   : > { %v1342_v25 = vadd.f32 1e-05, %v1341_v24 }
 0x841   : > { %2730 = vrsqrt.f32 %v1342_v25 }
 0x84b   : > { %v2731_v33 = vpop.eup %2730 }
 0x84c   : > { %v1344_v34 = vmul.f32 %v2731_v33, %v1337_v61  ;;  %v2708_v61 = vld [vmem:[#allocation14 + $0x30] sm:$0xff]  }
 0x84e   : > { %v1349_v37 = vmul.f32 %v1348_v29, %v1344_v34 }
 0x850   : > { %v3515_v38 = vadd.f32 %v1353_v35, %v1349_v37 }
 0x852   : > { %v1355_v0 = vpack.c.bf16 %v3515_v38, %v3515_v38 }
 0x854   : > { %1608 = vmatmul.mubr.bf16.vlgmr.msra.gmra.mrb[28].mxu1 %v1355_v0  ;;  %1649 = vmatmul.mubr.bf16.vlgmr.msra.gmra.mrb[16].mxu0 %v1355_v0 }
 0x855   : > { %2349 = vmatpush3.bf16.msra.mxu1 %v2684_v39  ;;  %2371 = vmatpush3.bf16.msra.mxu0 %v2685_v40 }
 0x856   : > { %2350 = vmatprep.subr.bf16.mxu1 %v2686_v41  ;;  %2372 = vmatprep.subr.bf16.mxu0 %v2687_v42  ;;  %v1359_v42 = vrot.slane %v3422_v32, %v1358_v5 }
 0x859   : > { %2351 = vmatpush3.bf16.msra.mxu1 %v2688_v43  ;;  %2373 = vmatpush3.bf16.msra.mxu0 %v2689_v44 }
 0x85a   : > { %2352 = vmatprep.subr.bf16.mxu1 %v2690_v45  ;;  %2374 = vmatprep.subr.bf16.mxu0 %v2691_v46 }
 0x85d   : > { %2353 = vmatpush3.bf16.msra.mxu1 %v2692_v47  ;;  %2375 = vmatpush3.bf16.msra.mxu0 %v2693_v48 }
 0x85e   : > { %2354 = vmatprep.subr.bf16.mxu1 %v2694_v49  ;;  %2376 = vmatprep.subr.bf16.mxu0 %v2695_v50 }
 0x861   : > { %2355 = vmatpush3.bf16.msra.mxu1 %v2696_v51  ;;  %2377 = vmatpush3.bf16.msra.mxu0 %v2697_v52 }
 0x862   : > { %2356 = vmatprep.subr.bf16.mxu1 %v2698_v53  ;;  %2378 = vmatprep.subr.bf16.mxu0 %v2699_v54 }
 0x865   : > { %2357 = vmatpush3.bf16.msra.mxu1 %v2700_v1  ;;  %2379 = vmatpush3.bf16.msra.mxu0 %v2701_v55  ;;  %v2016_v1 = vsub.s32 5, %v3414_v30  ;;  %v2021_v55 = vsub.s32 6, %v3414_v30 }
 0x866   : > { %2358 = vmatprep.subr.bf16.mxu1 %v2702_v56  ;;  %2380 = vmatprep.subr.bf16.mxu0 %v2703_v57 }
 0x869   : > { %2359 = vmatpush3.bf16.msra.mxu1 %v2704_v58  ;;  %2381 = vmatpush3.bf16.msra.mxu0 %v2705_v26  ;;  %v2022_v58 = vrot.slane %v3422_v32, %v2021_v55 }
 0x86a   : > { %2360 = vmatprep.subr.bf16.mxu1 %v2706_v59  ;;  %2382 = vmatprep.subr.bf16.mxu0 %v2707_v60 }
 0x86d   : > { %2361 = vmatpush3.bf16.msra.mxu1 %v2708_v61  ;;  %2383 = vmatpush3.bf16.msra.mxu0 %v2709_v62 }
 0x86e   : > { %2362 = vmatprep.subr.bf16.mxu1 %v2710_v63  ;;  %2384 = vmatprep.subr.bf16.mxu0 %v2711_v2 }
 0x871   : > { %2363 = vmatpush3.bf16.msra.mxu1 %v2712_v3  ;;  %2385 = vmatpush3.bf16.msra.mxu0 %v2713_v4 }
 0x927   : > { %v1609_v11 = vpop.f32.mrb[28].mxu1  ;;  %v1650_v12 = vpop.f32.mrb[16].mxu0 }
 0x928   : > { %v1610_v13 = vadd.f32 %v1609_v11, %v1398_v7  ;;  %v1651_v14 = vadd.f32 %v1650_v12, %v1406_v8  ;;  %v1611_v15 = vpop.f32.mrb[29].mxu1  ;;  %v1652_v16 = vpop.f32.mrb[17].mxu0 }
 0x929   : > { %v1612_v17 = vadd.f32 %v1611_v15, %v1402_v9  ;;  %v1653_v18 = vadd.f32 %v1652_v16, %v1410_v10  ;;  %v1613_v19 = vpop.f32.mrb[30].mxu1  ;;  %v1654_v20 = vpop.f32.mrb[18].mxu0 }
 0x92a   : > { %v1657_v21 = vmax.f32 %v1610_v13, 0.0  ;;  %v1659_v22 = vmax.f32 %v1651_v14, 0.0  ;;  %v1614_v23 = vpop.f32.mrb[31].mxu1  ;;  %v1655_v31 = vpop.f32.mrb[19].mxu0 }
 0x92b   : > { %v1658_v24 = vmax.f32 %v1612_v17, 0.0  ;;  %v1660_v25 = vmax.f32 %v1653_v18, 0.0 }
 0x92c   : > { %v1661_v29 = vpack.c.bf16 %v1657_v21, %v1657_v21  ;;  %v1663_v27 = vpack.c.bf16 %v1659_v22, %v1659_v22 }
 0x92d   : > { %v1662_v36 = vpack.c.bf16 %v1658_v24, %v1658_v24  ;;  %v1664_v28 = vpack.c.bf16 %v1660_v25, %v1660_v25 }
 0x92f   : > { %1953 = vmatprep.mubr.bf16.mxu1 %v1662_v36  ;;  %1993 = vmatprep.mubr.bf16.mxu0 %v1664_v28 }
 0x930   : > { %1954 = vmatmul.mubr.bf16.vlgmr.msra.gmra.mrb[32].mxu1 %v1661_v29  ;;  %1994 = vmatmul.mubr.bf16.vlgmr.msra.gmra.mrb[20].mxu0 %v1663_v27 }
 0xa03   : > { %v2364_v33 = vpop.f32.mrb[32].mxu1  ;;  %v2386_v34 = vpop.f32.mrb[20].mxu0 }
 0xa04   : > { %v2365_v35 = vpop.f32.mrb[33].mxu1  ;;  %v2387_v37 = vpop.f32.mrb[21].mxu0 }
 0xa05   : > { %v2366_v39 = vadd.f32 %v2365_v35, %v2364_v33  ;;  %v2388_v40 = vadd.f32 %v2387_v37, %v2386_v34  ;;  %v2367_v0 = vpop.f32.mrb[34].mxu1  ;;  %v2389_v41 = vpop.f32.mrb[22].mxu0 }
 0xa06   : > { %v2368_v43 = vpop.f32.mrb[35].mxu1  ;;  %v2390_v44 = vpop.f32.mrb[23].mxu0 }
 0xa07   : > { %v1996_v45 = vadd.f32 %v2388_v40, %v2366_v39 }
 0xa09   : > { %v2001_v46 = vadd.f32 %v1996_v45, %v1359_v42 }
 0xa0b   : > { %v2002_v47 = vadd.f32 %v2001_v46, %v3515_v38  ;;  %v2017_v38 = vrot.slane %v3422_v32, %v2016_v1 }
 0xa0d   : > { %2003 = vadd.xlane.f32.xlu0 %v2002_v47 }
 0xa9a   : > { %v2004_v48 = vpop.xlane.xlu0 %2003 }
 0xa9b   : > { %v2005_v49 = vmul.f32 0.0078125, %v2004_v48 }
 0xa9d   : > { %v2006_v50 = vsub.f32 %v2002_v47, %v2005_v49 }
 0xa9f   : > { %v2007_v51 = vmul.f32 %v2006_v50, %v2006_v50 }
 0xaa1   : > { %2008 = vadd.xlane.f32.xlu1 %v2007_v51 }
 0xb2e   : > { %v2009_v52 = vpop.xlane.xlu1 %2008 }
 0xb2f   : > { %v2010_v53 = vmul.f32 0.0078125, %v2009_v52 }
 0xb31   : > { %v2011_v54 = vadd.f32 1e-05, %v2010_v53 }
 0xb33   : > { %2732 = vrsqrt.f32 %v2011_v54 }
 0xb3d   : > { %v2733_v56 = vpop.eup %2732 }
 0xb3e   : > { %v2013_v57 = vmul.f32 %v2733_v56, %v2006_v50 }
 0xb40   : > { %v2018_v26 = vmul.f32 %v2017_v38, %v2013_v57 }
 0xb42   : > { %v2023_v59 = vadd.f32 %v2022_v58, %v2018_v26 }
 0xb44   : > { %2024 = vst [vmem:[%s483_s17] sm:$0xff] %v2023_v59 }
 0xb45   : > { %2947 = shalt.err (!%p2944_p2)
}
 0xb46   : > { %s2948_s4 = scalar_lea.hbm %s3539_s24, 128  ;;  %s2952_s2 = scalar_lea.hbm %s3633_s12, 256 }
 0xb47   : > { %p2949_p4 = scmp.ne.s32.totalorder %s3539_s24, %s2948_s4  ;;  %p2953_p10 = scmp.lt.u32.totalorder %s3539_s24, %s3633_s12 }
 0xb48   : > { %p2954_p1 = scmp.lt.u32.totalorder %s2952_s2, %s2948_s4  ;;  %p2956_p12 = scmp.lt.u32.totalorder %s2948_s4, %s3539_s24 }
 0xb49   : > { %p2950_p8 = pnand %p2949_p4, %p3634_p13 }
 0xb4a   : > { %p2955_p11 = por %p2954_p1, %p2953_p10 }
 0xb4b   : > { %p2951_p7 = pneg %p2950_p8 }
 0xb4c   : > { %p2957_p6 = por %p2956_p12, %p2955_p11 }
 0xb4e   : > { %p2958_p9 = pnand %p2957_p6, %p2951_p7 }
 0xb50   : > { %2961 = shalt.err (!%p2958_p9)
}
 0xb51   : > { %2504 = dma.vmem_to_hbm [thread:$0]  (%p3634_p13), %s3541_s0, 128, %s3539_s24, %s2026_s18  }
 0xb52 PF: > { %s2051_s22 = sand.u32 1, %s3004_s13   ;;  %p3635_p0 = scmp.ne.s32.totalorder %s3620_s27, 0 }
 0xb53   : > { %p3636_p5 = scmp.ge.s32.totalorder %s3016_s16, 2  ;;  %s2052_s17 = scalar_lea.sflag [#allocation5], %s2051_s22 }
 0xb55   : > { %p2530_p3 = pnand %p3636_p5, %p3635_p0 }
 0xb57   : > { %2999 = dma.done.wait (!%p2530_p3), %s2052_s17, 128  }
 0xb58   : > { %3001 = vsyncadd (!%p2530_p3), %s2052_s17, 4294967168  ;;  %p28_p2 = scmp.ge.s32.totalorder %s3256_s11, 4   ;;  %s3637_s13 = smov %s3008_s14 }
 0xb59   : > { %s3638_s14 = smov %s3012_s15  ;;  %s3639_s15 = smov %s3268_s3 }
 0xb5a   : > { %s3640_s16 = smov %s3256_s11  ;;  %30 = sbr.rel (!%p28_p2) target bundleno = 16 (0x10), region = 138 }
 0xb61   :  { %2057 = vsyncpa [#allocation4], 1 }
 0xb62   :  { %2059 = vsyncpa [#allocation4 + $0x1], 1 }
 0xb63   :  { %2060 = vsyncpa [#allocation7], 1 }
 0xb64   :  { %2062 = vsyncpa [#allocation7 + $0x1], 1 }
 0xb65   :  { %2063 = vsyncpa [#allocation10], 1 }
 0xb66   :  { %2064 = vsyncpa [#allocation13], 1 }
 0xb67   :  { %2065 = vsyncpa [#allocation5], 1 }
 0xb68   :  { %2067 = vsyncpa [#allocation5 + $0x1], 1 }

</bundles_post_ra>
